<compile_context>
chip_gen: v6e
topology: v6e:2x2x1
jax: 0.10.0
libtpu: 0.0.40
codegen_flags: <defaults>
</compile_context>

<pallas_src>
import functools

import jax
import jax.numpy as jnp
from jax import lax
from jax.experimental import pallas as pl
from jax.experimental.pallas import tpu as pltpu

F32 = jnp.float32
BF16 = jnp.bfloat16
LN_EPS = 1e-5


def _vmem_limit_bytes():
    """Generation-aware VMEM limit (96 MiB on v5e/v6e, 48 MiB on v7x)."""
    cap = 64 * 1024 * 1024  # conservative default (v7x-sized)
    try:
        info = pltpu.get_tpu_info()
        cap = int(getattr(info, "vmem_capacity_bytes", cap))
    except Exception:
        pass
    return min((cap * 3) // 4, 100 * 1024 * 1024)


# ----------------------------------------------------------------------------
# Fused multi-head-attention kernel
#   grid = (B, Lq // tq); both axes "parallel".
#   Per-head (static unrolled loop, small n_head):
#     q/k/v projection (per-head weight block), scores, softmax, AV, and the
#     output fc accumulated in f32 -- no concat, no lane-narrow slices.
#   Epilogue: residual + LayerNorm + non-pad-mask.
# ----------------------------------------------------------------------------
def _mha_kernel(*refs, n_head, has_mask):
    if has_mask:
        (q_ref, kv_ref, npm_ref, mask_ref,
         wq_ref, bq_ref, wk_ref, bk_ref, wv_ref, bv_ref,
         wfc_ref, bfc_ref, g_ref, b_ref, out_ref, attn_ref) = refs
    else:
        (q_ref, kv_ref, npm_ref,
         wq_ref, bq_ref, wk_ref, bk_ref, wv_ref, bv_ref,
         wfc_ref, bfc_ref, g_ref, b_ref, out_ref, attn_ref) = refs
        mask_ref = None

    xq = q_ref[0]                      # (tq, D) bf16 -- also the residual
    xkv = kv_ref[0]                    # (Lk, D) bf16

    if has_mask:
        # {0,1} int8 mask -> additive bias, computed ONCE (hoisted out of head loop)
        bias = mask_ref[0].astype(jnp.float32) * jnp.float32(-1e10)   # (tq, Lk)

    tq, D = xq.shape
    acc = jnp.zeros((tq, D), jnp.float32)

    for h in range(n_head):            # static unroll; weight blocks are ref views
        # 1/temperature is pre-folded into wq / bq at init.
        q_h = jnp.dot(xq, wq_ref[h], preferred_element_type=jnp.float32) + bq_ref[h]
        k_h = jnp.dot(xkv, wk_ref[h], preferred_element_type=jnp.float32) + bk_ref[h]
        v_h = jnp.dot(xkv, wv_ref[h], preferred_element_type=jnp.float32) + bv_ref[h]

        # scores = q_h @ k_h^T (contract on d_k, no explicit transpose)
        s = lax.dot_general(q_h.astype(BF16), k_h.astype(BF16),
                            (((1,), (1,)), ((), ())),
                            preferred_element_type=jnp.float32)       # (tq, Lk)
        if has_mask:
            s = s + bias

        m = jnp.max(s, axis=-1, keepdims=True)
        e = jnp.exp(s - m)
        p = e * (1.0 / jnp.sum(e, axis=-1, keepdims=True))            # exact softmax
        attn_ref[0, h] = p.astype(attn_ref.dtype)

        av = jnp.dot(p.astype(BF16), v_h.astype(BF16),
                     preferred_element_type=jnp.float32)              # (tq, dv)
        # contract this head straight into the fc output (f32 accumulate)
        acc = acc + jnp.dot(av.astype(BF16), wfc_ref[h],
                            preferred_element_type=jnp.float32)       # (tq, D)

    # dropout (eval) -> identity; residual + LayerNorm + non-pad-mask
    y = acc + bfc_ref[...] + xq.astype(jnp.float32)
    mean = jnp.mean(y, axis=-1, keepdims=True)
    var = jnp.mean((y - mean) ** 2, axis=-1, keepdims=True)
    yn = (y - mean) * lax.rsqrt(var + LN_EPS)
    out_ref[0] = ((yn * g_ref[...] + b_ref[...]) * npm_ref[0]).astype(out_ref.dtype)


def _pick_q_tile(Lq, Lk, H, D, d_k, d_v, vmem_limit):
    candidates = [t for t in (512, 256, 128) if Lq % t == 0]
    if not candidates:
        return Lq                      # short sequences: one tile per batch element
    for t in candidates:               # largest tile whose working set fits comfortably
        need = (2 * t * D * 2 + 2 * Lk * D * 2            # q / kv blocks (bf16, 2-buffered)
                + 2 * t * Lk                              # int8 mask block
                + 2 * H * t * Lk * 2 + 2 * t * D * 2      # attn / out blocks (bf16, 2-buffered)
                + H * t * Lk * 4 + t * D * 4              # in-flight f32 scores / accumulator
                + (2 * H * D * d_k + H * D * d_v + H * d_v * D) * 2)  # resident weights
        if need <= vmem_limit // 2:
            return t
    return candidates[-1]


def multi_head_attention(p, q, kv, npm, mask=None):
    """p: param dict; q: (B, Lq, D); kv: (B, Lk, D); npm: (B, Lq, 1)."""
    n_head, d_k, d_v = p["n_head"], p["d_k"], p["d_v"]
    B, Lq, D = q.shape
    Lk = kv.shape[1]
    has_mask = mask is not None
    vmem_limit = _vmem_limit_bytes()
    tq = _pick_q_tile(Lq, Lk, n_head, D, d_k, d_v, vmem_limit)
    n_tq = Lq // tq

    kern = functools.partial(_mha_kernel, n_head=n_head, has_mask=has_mask)

    in_specs = [
        pl.BlockSpec((1, tq, D), lambda b, i: (b, i, 0)),     # q input / residual (bf16)
        pl.BlockSpec((1, Lk, D), lambda b, i: (b, 0, 0)),     # kv input (bf16)
        pl.BlockSpec((1, tq, 1), lambda b, i: (b, i, 0)),     # non-pad mask (f32)
    ]
    operands = [q.astype(BF16), kv.astype(BF16), npm.astype(F32)]
    if has_mask:
        in_specs.append(pl.BlockSpec((1, tq, Lk), lambda b, i: (b, i, 0)))  # int8 mask
        operands.append(mask.astype(jnp.int8))

    in_specs += [
        pl.BlockSpec((n_head, D, d_k), lambda b, i: (0, 0, 0)),   # Wq (1/temp folded)
        pl.BlockSpec((n_head, 1, d_k), lambda b, i: (0, 0, 0)),   # bq
        pl.BlockSpec((n_head, D, d_k), lambda b, i: (0, 0, 0)),   # Wk
        pl.BlockSpec((n_head, 1, d_k), lambda b, i: (0, 0, 0)),   # bk
        pl.BlockSpec((n_head, D, d_v), lambda b, i: (0, 0, 0)),   # Wv
        pl.BlockSpec((n_head, 1, d_v), lambda b, i: (0, 0, 0)),   # bv
        pl.BlockSpec((n_head, d_v, D), lambda b, i: (0, 0, 0)),   # Wfc (per-head slabs)
        pl.BlockSpec((1, D), lambda b, i: (0, 0)),                # bfc
        pl.BlockSpec((1, D), lambda b, i: (0, 0)),                # LN gamma
        pl.BlockSpec((1, D), lambda b, i: (0, 0)),                # LN beta
    ]
    operands += [p["wq"], p["bq"], p["wk"], p["bk"], p["wv"], p["bv"],
                 p["wfc"], p["bfc"], p["ln_g"], p["ln_b"]]

    proj_flops = (2 * B * Lq * D * n_head * d_k
                  + 2 * B * n_tq * Lk * D * n_head * (d_k + d_v))
    attn_flops = 2 * B * n_head * Lq * Lk * (d_k + d_v)
    fc_flops = 2 * B * Lq * n_head * d_v * D
    w_bytes = ((2 * n_head * D * d_k + n_head * D * d_v + n_head * d_v * D) * 2
               + (2 * n_head * d_k + n_head * d_v) * 4 + 3 * D * 4)
    bytes_accessed = (B * Lq * D * 2 + B * n_tq * Lk * D * 2
                      + (B * Lq * Lk if has_mask else 0) + B * Lq * 4
                      + w_bytes + B * Lq * D * 2 + B * n_head * Lq * Lk * 2)
    cost = pl.CostEstimate(flops=proj_flops + attn_flops + fc_flops,
                           transcendentals=B * n_head * Lq * Lk,
                           bytes_accessed=bytes_accessed)

    out, attn = pl.pallas_call(
        kern,
        out_shape=(
            jax.ShapeDtypeStruct((B, Lq, D), BF16),                 # sub-layer output
            jax.ShapeDtypeStruct((B, n_head, Lq, Lk), BF16),        # attention probs
        ),
        grid=(B, n_tq),
        in_specs=in_specs,
        out_specs=(
            pl.BlockSpec((1, tq, D), lambda b, i: (b, i, 0)),
            pl.BlockSpec((1, n_head, tq, Lk), lambda b, i: (b, 0, i, 0)),
        ),
        compiler_params=pltpu.CompilerParams(
            dimension_semantics=("parallel", "parallel"),
            vmem_limit_bytes=vmem_limit,
        ),
        cost_estimate=cost,
    )(*operands)

    # torch layout: (n_head * B, Lq, Lk), head-major
    attn = jnp.transpose(attn, (1, 0, 2, 3)).reshape(n_head * B, Lq, Lk)
    return out, attn


# ----------------------------------------------------------------------------
# Fused position-wise feed-forward kernel (row-tiled grid, resident weights)
#   o = LayerNorm(relu(x @ W1 + b1) @ W2 + b2 + x) * npm
# ----------------------------------------------------------------------------
def _ffn_kernel(x_ref, npm_ref, w1_ref, b1_ref, w2_ref, b2_ref, g_ref, b_ref, o_ref):
    x = x_ref[...]                                                    # (tm, D) bf16
    h = jnp.dot(x, w1_ref[...], preferred_element_type=jnp.float32) + b1_ref[...]
    h = jnp.maximum(h, 0.0)
    y = jnp.dot(h.astype(BF16), w2_ref[...],
                preferred_element_type=jnp.float32) + b2_ref[...]
    # dropout (eval) -> identity; residual + LayerNorm + non-pad-mask
    y = y + x.astype(jnp.float32)
    mean = jnp.mean(y, axis=-1, keepdims=True)
    var = jnp.mean((y - mean) ** 2, axis=-1, keepdims=True)
    yn = (y - mean) * lax.rsqrt(var + LN_EPS)
    o_ref[...] = ((yn * g_ref[...] + b_ref[...]) * npm_ref[...]).astype(o_ref.dtype)


def _pick_row_tile(D, Dh, vmem_limit):
    for t in (512, 256, 128):
        need = (2 * t * D * 2 + 2 * t * D * 4     # bf16 in / f32 out, double-buffered
                + t * Dh * 6                      # f32 hidden + bf16 recast
                + 2 * 2 * D * Dh * 2)             # resident bf16 weights (worst case)
        if need <= vmem_limit // 2:
            return t
    return 128


def pos_ffn(p, x, npm):
    """x: (B, L, D) (any float dtype); npm: (B, L, 1). Returns f32 (B, L, D)."""
    B, L, D = x.shape
    Dh = p["w1"].shape[1]
    M = B * L
    vmem_limit = _vmem_limit_bytes()
    tm = _pick_row_tile(D, Dh, vmem_limit)
    Mp = pl.cdiv(M, tm) * tm           # pad rows so the grid always pipelines
    x2d = x.reshape(M, D).astype(BF16)
    npm2d = npm.reshape(M, 1).astype(F32)
    if Mp != M:
        x2d = jnp.pad(x2d, ((0, Mp - M), (0, 0)))
        npm2d = jnp.pad(npm2d, ((0, Mp - M), (0, 0)))

    cost = pl.CostEstimate(
        flops=4 * Mp * D * Dh,
        transcendentals=0,
        bytes_accessed=Mp * D * 2 + Mp * 4 + Mp * D * 4 + 2 * D * Dh * 2 + (D + Dh) * 4,
    )

    out = pl.pallas_call(
        _ffn_kernel,
        out_shape=jax.ShapeDtypeStruct((Mp, D), F32),
        grid=(Mp // tm,),
        in_specs=[
            pl.BlockSpec((tm, D), lambda i: (i, 0)),        # activations (tiled rows)
            pl.BlockSpec((tm, 1), lambda i: (i, 0)),        # non-pad mask
            pl.BlockSpec((D, Dh), lambda i: (0, 0)),        # W1 (resident)
            pl.BlockSpec((1, Dh), lambda i: (0, 0)),
            pl.BlockSpec((Dh, D), lambda i: (0, 0)),        # W2 (resident)
            pl.BlockSpec((1, D), lambda i: (0, 0)),
            pl.BlockSpec((1, D), lambda i: (0, 0)),         # LN gamma
            pl.BlockSpec((1, D), lambda i: (0, 0)),         # LN beta
        ],
        out_specs=pl.BlockSpec((tm, D), lambda i: (i, 0)),
        compiler_params=pltpu.CompilerParams(
            dimension_semantics=("parallel",),
            vmem_limit_bytes=vmem_limit,
        ),
        cost_estimate=cost,
    )(x2d, npm2d, p["w1"], p["b1"], p["w2"], p["b2"], p["ln_g"], p["ln_b"])
    return out[:M].reshape(B, L, D)


# ----------------------------------------------------------------------------
# Decoder layer
# ----------------------------------------------------------------------------
def single_decoder_layer(params, dec_input, enc_output, non_pad_mask,
                         slf_attn_mask=None, dec_enc_attn_mask=None):
    if non_pad_mask is None:
        non_pad_mask = jnp.ones(dec_input.shape[:2] + (1,), F32)
    dec_output, dec_slf_attn = multi_head_attention(
        params["slf_attn"], dec_input, dec_input, non_pad_mask, mask=slf_attn_mask)
    dec_output, dec_enc_attn = multi_head_attention(
        params["enc_attn"], dec_output, enc_output, non_pad_mask, mask=dec_enc_attn_mask)
    dec_output = pos_ffn(params["pos_ffn"], dec_output, non_pad_mask)
    return dec_output, dec_slf_attn, dec_enc_attn


# ----------------------------------------------------------------------------
# Parameter initialization (matches shapes/stds of the PyTorch module); weights
# are stored pre-transposed in per-head layout (bf16 MXU operands), biases f32,
# and 1/temperature is folded into Wq / b_q once.
# ----------------------------------------------------------------------------
def init_mha_params(key, n_head, d_model, d_k, d_v):
    ks = jax.random.split(key, 8)
    std_qk = (2.0 / (d_model + d_k)) ** 0.5
    std_v = (2.0 / (d_model + d_v)) ** 0.5
    std_fc = (2.0 / (n_head * d_v + d_model)) ** 0.5      # xavier_normal_
    bb_in = 1.0 / (d_model ** 0.5)
    bb_fc = 1.0 / ((n_head * d_v) ** 0.5)
    inv_temp = 1.0 / (float(d_k) ** 0.5)

    w_qs = std_qk * jax.random.normal(ks[0], (n_head * d_k, d_model), F32)
    b_qs = jax.random.uniform(ks[1], (n_head * d_k,), F32, -bb_in, bb_in)
    w_ks = std_qk * jax.random.normal(ks[2], (n_head * d_k, d_model), F32)
    b_ks = jax.random.uniform(ks[3], (n_head * d_k,), F32, -bb_in, bb_in)
    w_vs = std_v * jax.random.normal(ks[4], (n_head * d_v, d_model), F32)
    b_vs = jax.random.uniform(ks[5], (n_head * d_v,), F32, -bb_in, bb_in)
    w_fc = std_fc * jax.random.normal(ks[6], (d_model, n_head * d_v), F32)
    b_fc = jax.random.uniform(ks[7], (d_model,), F32, -bb_fc, bb_fc)

    return {
        "n_head": n_head, "d_k": d_k, "d_v": d_v,
        # per-head layouts: wq/wk: (H, D, dk), wv: (H, D, dv), wfc: (H, dv, D)
        "wq": (w_qs.reshape(n_head, d_k, d_model).transpose(0, 2, 1) * inv_temp).astype(BF16),
        "bq": (b_qs.reshape(n_head, 1, d_k) * inv_temp).astype(F32),
        "wk": w_ks.reshape(n_head, d_k, d_model).transpose(0, 2, 1).astype(BF16),
        "bk": b_ks.reshape(n_head, 1, d_k).astype(F32),
        "wv": w_vs.reshape(n_head, d_v, d_model).transpose(0, 2, 1).astype(BF16),
        "bv": b_vs.reshape(n_head, 1, d_v).astype(F32),
        "wfc": w_fc.T.reshape(n_head, d_v, d_model).astype(BF16),
        "bfc": b_fc.reshape(1, d_model).astype(F32),
        "ln_g": jnp.ones((1, d_model), F32),
        "ln_b": jnp.zeros((1, d_model), F32),
    }


def init_ffn_params(key, d_in, d_hid):
    ks = jax.random.split(key, 4)
    b1 = 1.0 / (d_in ** 0.5)
    b2 = 1.0 / (d_hid ** 0.5)
    w1 = jax.random.uniform(ks[0], (d_hid, d_in), F32, -b1, b1)   # Conv1d(d_in,d_hid,1)
    w2 = jax.random.uniform(ks[2], (d_in, d_hid), F32, -b2, b2)
    return {
        "w1": w1.T.astype(BF16),                                   # (d_in, d_hid)
        "b1": jax.random.uniform(ks[1], (d_hid,), F32, -b1, b1).reshape(1, -1),
        "w2": w2.T.astype(BF16),                                   # (d_hid, d_in)
        "b2": jax.random.uniform(ks[3], (d_in,), F32, -b2, b2).reshape(1, -1),
        "ln_g": jnp.ones((1, d_in), F32),
        "ln_b": jnp.zeros((1, d_in), F32),
    }


def init_decoder_params(key, d_model, d_inner, n_head, d_k, d_v):
    k1, k2, k3 = jax.random.split(key, 3)
    return {
        "slf_attn": init_mha_params(k1, n_head, d_model, d_k, d_v),
        "enc_attn": init_mha_params(k2, n_head, d_model, d_k, d_v),
        "pos_ffn": init_ffn_params(k3, d_model, d_inner),
    }


# ----------------------------------------------------------------------------
# Pure-JAX f32 reference (uses the same stored params) for a sanity check.
# ----------------------------------------------------------------------------
def _ref_mha(p, q, kv, npm, mask):
    wq, wk, wv = p["wq"].astype(F32), p["wk"].astype(F32), p["wv"].astype(F32)
    wfc = p["wfc"].astype(F32)
    qh = jnp.einsum("bld,hdk->bhlk", q, wq) + p["bq"][None]
    kh = jnp.einsum("bld,hdk->bhlk", kv, wk) + p["bk"][None]
    vh = jnp.einsum("bld,hdv->bhlv", kv, wv) + p["bv"][None]
    s = jnp.einsum("bhqd,bhkd->bhqk", qh, kh)            # 1/temp already folded in wq/bq
    if mask is not None:
        s = jnp.where(mask[:, None, :, :].astype(bool), -1e10, s)
    attn = jax.nn.softmax(s, axis=-1)
    o = jnp.einsum("bhqk,bhkv->bhqv", attn, vh)
    fc = jnp.einsum("bhqv,hvd->bqd", o, wfc) + p["bfc"]
    y = fc + q
    mean = y.mean(-1, keepdims=True)
    var = ((y - mean) ** 2).mean(-1, keepdims=True)
    yn = (y - mean) / jnp.sqrt(var + LN_EPS)
    return (yn * p["ln_g"] + p["ln_b"]) * npm


def _ref_ffn(p, x, npm):
    h = jnp.maximum(jnp.einsum("bld,dh->blh", x, p["w1"].astype(F32)) + p["b1"], 0.0)
    y = jnp.einsum("blh,hd->bld", h, p["w2"].astype(F32)) + p["b2"] + x
    mean = y.mean(-1, keepdims=True)
    var = ((y - mean) ** 2).mean(-1, keepdims=True)
    yn = (y - mean) / jnp.sqrt(var + LN_EPS)
    return (yn * p["ln_g"] + p["ln_b"]) * npm


def _ref_layer(params, dec_input, enc_output, npm, slf_mask, enc_mask):
    x = _ref_mha(params["slf_attn"], dec_input, dec_input, npm, slf_mask)
    x = _ref_mha(params["enc_attn"], x, enc_output, npm, enc_mask)
    return _ref_ffn(params["pos_ffn"], x, npm)


# TODO(synk): nn.Dropout in training mode (stochastic) is not reproduced;
# inference-mode (identity) semantics are implemented.

if __name__ == "__main__":
    B, L, Lenc = 2, 8, 16
    d_model, d_inner, n_head, d_k, d_v = 32, 64, 4, 8, 8

    root = jax.random.PRNGKey(0)
    kp, kx, ke = jax.random.split(root, 3)

    params = init_decoder_params(kp, d_model, d_inner, n_head, d_k, d_v)

    dec_input = jax.random.normal(kx, (B, L, d_model), F32)
    enc_output = jax.random.normal(ke, (B, Lenc, d_model), F32)

    # non_pad_mask: (B, L, 1), last position of batch 1 is padding
    non_pad_mask = jnp.ones((B, L, 1), F32).at[1, -1, 0].set(0.0)
    # causal self-attention mask (True = masked), (B, L, L)
    causal = jnp.triu(jnp.ones((L, L), dtype=bool), k=1)
    slf_attn_mask = jnp.broadcast_to(causal, (B, L, L))
    # dec-enc mask: batch 1 cannot attend to the last encoder position
    dec_enc_attn_mask = jnp.zeros((B, L, Lenc), dtype=bool).at[1, :, -1].set(True)

    dec_out, slf_attn, enc_attn = single_decoder_layer(
        params, dec_input, enc_output, non_pad_mask,
        slf_attn_mask=slf_attn_mask, dec_enc_attn_mask=dec_enc_attn_mask)
    jax.block_until_ready((dec_out, slf_attn, enc_attn))

    assert dec_out.shape == (B, L, d_model)
    assert slf_attn.shape == (n_head * B, L, L)
    assert enc_attn.shape == (n_head * B, L, Lenc)

    # numerical sanity check against an f32 pure-JAX reference (bf16 activations
    # and matmul operands in the kernels -> loose tolerance)
    ref = _ref_layer(params, dec_input, enc_output, non_pad_mask,
                     slf_attn_mask, dec_enc_attn_mask)
    max_err = float(jnp.max(jnp.abs(dec_out.astype(F32) - ref)))
    assert max_err < 0.15, f"max abs error {max_err}"

    # attention probabilities should (approximately) sum to 1 per query row
    row_sum_err = float(jnp.max(jnp.abs(jnp.sum(slf_attn.astype(F32), -1) - 1.0)))
    assert row_sum_err < 2e-2, f"attn row-sum error {row_sum_err}"

    print("KERNEL_OK")
</pallas_src>

<mosaic_0001>
module attributes {stable_mosaic.version = 11 : i64} {
  func.func @_mha_kernel(%arg0: i32, %arg1: i32, %arg2: memref<1x8x32xbf16, #tpu.memory_space<vmem>>, %arg3: memref<1x8x32xbf16, #tpu.memory_space<vmem>>, %arg4: memref<1x8x1xf32, #tpu.memory_space<vmem>>, %arg5: memref<1x8x8xi8, #tpu.memory_space<vmem>>, %arg6: memref<4x32x8xbf16, #tpu.memory_space<vmem>>, %arg7: memref<4x1x8xf32, #tpu.memory_space<vmem>>, %arg8: memref<4x32x8xbf16, #tpu.memory_space<vmem>>, %arg9: memref<4x1x8xf32, #tpu.memory_space<vmem>>, %arg10: memref<4x32x8xbf16, #tpu.memory_space<vmem>>, %arg11: memref<4x1x8xf32, #tpu.memory_space<vmem>>, %arg12: memref<4x8x32xbf16, #tpu.memory_space<vmem>>, %arg13: memref<1x32xf32, #tpu.memory_space<vmem>>, %arg14: memref<1x32xf32, #tpu.memory_space<vmem>>, %arg15: memref<1x32xf32, #tpu.memory_space<vmem>>, %arg16: memref<1x8x32xbf16, #tpu.memory_space<vmem>>, %arg17: memref<1x4x8x8xbf16, #tpu.memory_space<vmem>>) attributes {dimension_semantics = [#tpu.dimension_semantics<parallel>, #tpu.dimension_semantics<parallel>], iteration_bounds = array<i64: 2, 1>, scalar_prefetch = 0 : i64, scratch_operands = 0 : i64, tpu.core_type = #tpu.core_type<tc>, window_params = [{transform_indices = @transform_0, window_bounds = array<i64: 1, 8, 32>}, {transform_indices = @transform_1, window_bounds = array<i64: 1, 8, 32>}, {transform_indices = @transform_2, window_bounds = array<i64: 1, 8, 1>}, {transform_indices = @transform_3, window_bounds = array<i64: 1, 8, 8>}, {pipeline_mode = #tpu.pipeline_mode<synchronous>, transform_indices = @transform_4, window_bounds = array<i64: 4, 32, 8>}, {pipeline_mode = #tpu.pipeline_mode<synchronous>, transform_indices = @transform_5, window_bounds = array<i64: 4, 1, 8>}, {pipeline_mode = #tpu.pipeline_mode<synchronous>, transform_indices = @transform_6, window_bounds = array<i64: 4, 32, 8>}, {pipeline_mode = #tpu.pipeline_mode<synchronous>, transform_indices = @transform_7, window_bounds = array<i64: 4, 1, 8>}, {pipeline_mode = #tpu.pipeline_mode<synchronous>, transform_indices = @transform_8, window_bounds = array<i64: 4, 32, 8>}, {pipeline_mode = #tpu.pipeline_mode<synchronous>, transform_indices = @transform_9, window_bounds = array<i64: 4, 1, 8>}, {pipeline_mode = #tpu.pipeline_mode<synchronous>, transform_indices = @transform_10, window_bounds = array<i64: 4, 8, 32>}, {pipeline_mode = #tpu.pipeline_mode<synchronous>, transform_indices = @transform_11, window_bounds = array<i64: 1, 32>}, {pipeline_mode = #tpu.pipeline_mode<synchronous>, transform_indices = @transform_12, window_bounds = array<i64: 1, 32>}, {pipeline_mode = #tpu.pipeline_mode<synchronous>, transform_indices = @transform_13, window_bounds = array<i64: 1, 32>}, {transform_indices = @transform_14, window_bounds = array<i64: 1, 8, 32>}, {transform_indices = @transform_15, window_bounds = array<i64: 1, 4, 8, 8>}]} {
    %c0 = arith.constant 0 : index
    %c0_0 = arith.constant 0 : index
    %c0_1 = arith.constant 0 : index
    %0 = vector.load %arg2[%c0, %c0_0, %c0_1] : memref<1x8x32xbf16, #tpu.memory_space<vmem>>, vector<1x8x32xbf16>
    %1 = vector.shape_cast %0 : vector<1x8x32xbf16> to vector<8x32xbf16>
    %c0_2 = arith.constant 0 : index
    %c0_3 = arith.constant 0 : index
    %c0_4 = arith.constant 0 : index
    %2 = vector.load %arg3[%c0_2, %c0_3, %c0_4] : memref<1x8x32xbf16, #tpu.memory_space<vmem>>, vector<1x8x32xbf16>
    %3 = vector.shape_cast %2 : vector<1x8x32xbf16> to vector<8x32xbf16>
    %c0_5 = arith.constant 0 : index
    %c0_6 = arith.constant 0 : index
    %c0_7 = arith.constant 0 : index
    %4 = vector.load %arg5[%c0_5, %c0_6, %c0_7] : memref<1x8x8xi8, #tpu.memory_space<vmem>>, vector<1x8x8xi8>
    %5 = vector.shape_cast %4 : vector<1x8x8xi8> to vector<8x8xi8>
    %6 = arith.sitofp %5 : vector<8x8xi8> to vector<8x8xf32>
    %cst = arith.constant -1.000000e+10 : f32
    %7 = vector.broadcast %cst : f32 to vector<8x8xf32>
    %8 = arith.mulf %6, %7 : vector<8x8xf32>
    %cst_8 = arith.constant 0.000000e+00 : f32
    %9 = vector.broadcast %cst_8 : f32 to vector<8x32xf32>
    %c0_9 = arith.constant 0 : index
    %c0_10 = arith.constant 0 : index
    %c0_11 = arith.constant 0 : index
    %10 = vector.load %arg6[%c0_9, %c0_10, %c0_11] : memref<4x32x8xbf16, #tpu.memory_space<vmem>>, vector<1x32x8xbf16>
    %11 = vector.shape_cast %10 : vector<1x32x8xbf16> to vector<32x8xbf16>
    %cst_12 = arith.constant dense<0.000000e+00> : vector<8x8xf32>
    %12 = tpu.matmul %1, %11, %cst_12 {dimension_numbers = #tpu.dot_dimension_numbers<[1], [0], [0], [1], [0, 0, 1, 1], [], []>} : vector<8x32xbf16>, vector<32x8xbf16>, vector<8x8xf32> -> vector<8x8xf32>
    %c0_13 = arith.constant 0 : index
    %c0_14 = arith.constant 0 : index
    %c0_15 = arith.constant 0 : index
    %13 = vector.load %arg7[%c0_13, %c0_14, %c0_15] : memref<4x1x8xf32, #tpu.memory_space<vmem>>, vector<1x1x8xf32>
    %14 = vector.shape_cast %13 : vector<1x1x8xf32> to vector<1x8xf32>
    %15 = vector.broadcast %14 : vector<1x8xf32> to vector<8x8xf32>
    %16 = arith.addf %12, %15 : vector<8x8xf32>
    %c0_16 = arith.constant 0 : index
    %c0_17 = arith.constant 0 : index
    %c0_18 = arith.constant 0 : index
    %17 = vector.load %arg8[%c0_16, %c0_17, %c0_18] : memref<4x32x8xbf16, #tpu.memory_space<vmem>>, vector<1x32x8xbf16>
    %18 = vector.shape_cast %17 : vector<1x32x8xbf16> to vector<32x8xbf16>
    %cst_19 = arith.constant dense<0.000000e+00> : vector<8x8xf32>
    %19 = tpu.matmul %3, %18, %cst_19 {dimension_numbers = #tpu.dot_dimension_numbers<[1], [0], [0], [1], [0, 0, 1, 1], [], []>} : vector<8x32xbf16>, vector<32x8xbf16>, vector<8x8xf32> -> vector<8x8xf32>
    %c0_20 = arith.constant 0 : index
    %c0_21 = arith.constant 0 : index
    %c0_22 = arith.constant 0 : index
    %20 = vector.load %arg9[%c0_20, %c0_21, %c0_22] : memref<4x1x8xf32, #tpu.memory_space<vmem>>, vector<1x1x8xf32>
    %21 = vector.shape_cast %20 : vector<1x1x8xf32> to vector<1x8xf32>
    %22 = vector.broadcast %21 : vector<1x8xf32> to vector<8x8xf32>
    %23 = arith.addf %19, %22 : vector<8x8xf32>
    %c0_23 = arith.constant 0 : index
    %c0_24 = arith.constant 0 : index
    %c0_25 = arith.constant 0 : index
    %24 = vector.load %arg10[%c0_23, %c0_24, %c0_25] : memref<4x32x8xbf16, #tpu.memory_space<vmem>>, vector<1x32x8xbf16>
    %25 = vector.shape_cast %24 : vector<1x32x8xbf16> to vector<32x8xbf16>
    %cst_26 = arith.constant dense<0.000000e+00> : vector<8x8xf32>
    %26 = tpu.matmul %3, %25, %cst_26 {dimension_numbers = #tpu.dot_dimension_numbers<[1], [0], [0], [1], [0, 0, 1, 1], [], []>} : vector<8x32xbf16>, vector<32x8xbf16>, vector<8x8xf32> -> vector<8x8xf32>
    %c0_27 = arith.constant 0 : index
    %c0_28 = arith.constant 0 : index
    %c0_29 = arith.constant 0 : index
    %27 = vector.load %arg11[%c0_27, %c0_28, %c0_29] : memref<4x1x8xf32, #tpu.memory_space<vmem>>, vector<1x1x8xf32>
    %28 = vector.shape_cast %27 : vector<1x1x8xf32> to vector<1x8xf32>
    %29 = vector.broadcast %28 : vector<1x8xf32> to vector<8x8xf32>
    %30 = arith.addf %26, %29 : vector<8x8xf32>
    %31 = arith.truncf %16 : vector<8x8xf32> to vector<8x8xbf16>
    %32 = arith.truncf %23 : vector<8x8xf32> to vector<8x8xbf16>
    %cst_30 = arith.constant dense<0.000000e+00> : vector<8x8xf32>
    %33 = tpu.matmul %31, %32, %cst_30 {dimension_numbers = #tpu.dot_dimension_numbers<[1], [1], [0], [0], [0, 0, 1, 0], [], []>} : vector<8x8xbf16>, vector<8x8xbf16>, vector<8x8xf32> -> vector<8x8xf32>
    %34 = arith.addf %33, %8 : vector<8x8xf32>
    %cst_31 = arith.constant dense<0xFF800000> : vector<8xf32>
    %35 = vector.multi_reduction <maximumf>, %34, %cst_31 [1] : vector<8x8xf32> to vector<8xf32>
    %36 = vector.shape_cast %35 : vector<8xf32> to vector<8x1xf32>
    %37 = vector.broadcast %36 : vector<8x1xf32> to vector<8x8xf32>
    %38 = arith.subf %34, %37 : vector<8x8xf32>
    %39 = math.exp %38 : vector<8x8xf32>
    %cst_32 = arith.constant dense<0.000000e+00> : vector<8xf32>
    %40 = vector.multi_reduction <add>, %39, %cst_32 [1] : vector<8x8xf32> to vector<8xf32>
    %41 = vector.shape_cast %40 : vector<8xf32> to vector<8x1xf32>
    %cst_33 = arith.constant 1.000000e+00 : f32
    %42 = vector.broadcast %cst_33 : f32 to vector<8x1xf32>
    %43 = arith.divf %42, %41 : vector<8x1xf32>
    %44 = vector.broadcast %43 : vector<8x1xf32> to vector<8x8xf32>
    %45 = arith.mulf %39, %44 : vector<8x8xf32>
    %46 = arith.truncf %45 : vector<8x8xf32> to vector<8x8xbf16>
    %c0_34 = arith.constant 0 : index
    %c0_35 = arith.constant 0 : index
    %c0_36 = arith.constant 0 : index
    %c0_37 = arith.constant 0 : index
    %47 = vector.load %arg17[%c0_34, %c0_35, %c0_36, %c0_37] : memref<1x4x8x8xbf16, #tpu.memory_space<vmem>>, vector<1x1x8x8xbf16>
    %48 = vector.shape_cast %47 : vector<1x1x8x8xbf16> to vector<8x8xbf16>
    %49 = vector.shape_cast %46 : vector<8x8xbf16> to vector<1x1x8x8xbf16>
    tpu.vector_store %arg17[%c0_34, %c0_35, %c0_36, %c0_37], %49 {strides = array<i32>} : memref<1x4x8x8xbf16, #tpu.memory_space<vmem>>, vector<1x1x8x8xbf16>,
    %50 = arith.truncf %45 : vector<8x8xf32> to vector<8x8xbf16>
    %51 = arith.truncf %30 : vector<8x8xf32> to vector<8x8xbf16>
    %cst_38 = arith.constant dense<0.000000e+00> : vector<8x8xf32>
    %52 = tpu.matmul %50, %51, %cst_38 {dimension_numbers = #tpu.dot_dimension_numbers<[1], [0], [0], [1], [0, 0, 1, 1], [], []>} : vector<8x8xbf16>, vector<8x8xbf16>, vector<8x8xf32> -> vector<8x8xf32>
    %53 = arith.truncf %52 : vector<8x8xf32> to vector<8x8xbf16>
    %c0_39 = arith.constant 0 : index
    %c0_40 = arith.constant 0 : index
    %c0_41 = arith.constant 0 : index
    %54 = vector.load %arg12[%c0_39, %c0_40, %c0_41] : memref<4x8x32xbf16, #tpu.memory_space<vmem>>, vector<1x8x32xbf16>
    %55 = vector.shape_cast %54 : vector<1x8x32xbf16> to vector<8x32xbf16>
    %cst_42 = arith.constant dense<0.000000e+00> : vector<8x32xf32>
    %56 = tpu.matmul %53, %55, %cst_42 {dimension_numbers = #tpu.dot_dimension_numbers<[1], [0], [0], [1], [0, 0, 1, 1], [], []>} : vector<8x8xbf16>, vector<8x32xbf16>, vector<8x32xf32> -> vector<8x32xf32>
    %57 = arith.addf %9, %56 : vector<8x32xf32>
    %c1 = arith.constant 1 : index
    %c0_43 = arith.constant 0 : index
    %c0_44 = arith.constant 0 : index
    %58 = vector.load %arg6[%c1, %c0_43, %c0_44] : memref<4x32x8xbf16, #tpu.memory_space<vmem>>, vector<1x32x8xbf16>
    %59 = vector.shape_cast %58 : vector<1x32x8xbf16> to vector<32x8xbf16>
    %cst_45 = arith.constant dense<0.000000e+00> : vector<8x8xf32>
    %60 = tpu.matmul %1, %59, %cst_45 {dimension_numbers = #tpu.dot_dimension_numbers<[1], [0], [0], [1], [0, 0, 1, 1], [], []>} : vector<8x32xbf16>, vector<32x8xbf16>, vector<8x8xf32> -> vector<8x8xf32>
    %c1_46 = arith.constant 1 : index
    %c0_47 = arith.constant 0 : index
    %c0_48 = arith.constant 0 : index
    %61 = vector.load %arg7[%c1_46, %c0_47, %c0_48] : memref<4x1x8xf32, #tpu.memory_space<vmem>>, vector<1x1x8xf32>
    %62 = vector.shape_cast %61 : vector<1x1x8xf32> to vector<1x8xf32>
    %63 = vector.broadcast %62 : vector<1x8xf32> to vector<8x8xf32>
    %64 = arith.addf %60, %63 : vector<8x8xf32>
    %c1_49 = arith.constant 1 : index
    %c0_50 = arith.constant 0 : index
    %c0_51 = arith.constant 0 : index
    %65 = vector.load %arg8[%c1_49, %c0_50, %c0_51] : memref<4x32x8xbf16, #tpu.memory_space<vmem>>, vector<1x32x8xbf16>
    %66 = vector.shape_cast %65 : vector<1x32x8xbf16> to vector<32x8xbf16>
    %cst_52 = arith.constant dense<0.000000e+00> : vector<8x8xf32>
    %67 = tpu.matmul %3, %66, %cst_52 {dimension_numbers = #tpu.dot_dimension_numbers<[1], [0], [0], [1], [0, 0, 1, 1], [], []>} : vector<8x32xbf16>, vector<32x8xbf16>, vector<8x8xf32> -> vector<8x8xf32>
    %c1_53 = arith.constant 1 : index
    %c0_54 = arith.constant 0 : index
    %c0_55 = arith.constant 0 : index
    %68 = vector.load %arg9[%c1_53, %c0_54, %c0_55] : memref<4x1x8xf32, #tpu.memory_space<vmem>>, vector<1x1x8xf32>
    %69 = vector.shape_cast %68 : vector<1x1x8xf32> to vector<1x8xf32>
    %70 = vector.broadcast %69 : vector<1x8xf32> to vector<8x8xf32>
    %71 = arith.addf %67, %70 : vector<8x8xf32>
    %c1_56 = arith.constant 1 : index
    %c0_57 = arith.constant 0 : index
    %c0_58 = arith.constant 0 : index
    %72 = vector.load %arg10[%c1_56, %c0_57, %c0_58] : memref<4x32x8xbf16, #tpu.memory_space<vmem>>, vector<1x32x8xbf16>
    %73 = vector.shape_cast %72 : vector<1x32x8xbf16> to vector<32x8xbf16>
    %cst_59 = arith.constant dense<0.000000e+00> : vector<8x8xf32>
    %74 = tpu.matmul %3, %73, %cst_59 {dimension_numbers = #tpu.dot_dimension_numbers<[1], [0], [0], [1], [0, 0, 1, 1], [], []>} : vector<8x32xbf16>, vector<32x8xbf16>, vector<8x8xf32> -> vector<8x8xf32>
    %c1_60 = arith.constant 1 : index
    %c0_61 = arith.constant 0 : index
    %c0_62 = arith.constant 0 : index
    %75 = vector.load %arg11[%c1_60, %c0_61, %c0_62] : memref<4x1x8xf32, #tpu.memory_space<vmem>>, vector<1x1x8xf32>
    %76 = vector.shape_cast %75 : vector<1x1x8xf32> to vector<1x8xf32>
    %77 = vector.broadcast %76 : vector<1x8xf32> to vector<8x8xf32>
    %78 = arith.addf %74, %77 : vector<8x8xf32>
    %79 = arith.truncf %64 : vector<8x8xf32> to vector<8x8xbf16>
    %80 = arith.truncf %71 : vector<8x8xf32> to vector<8x8xbf16>
    %cst_63 = arith.constant dense<0.000000e+00> : vector<8x8xf32>
    %81 = tpu.matmul %79, %80, %cst_63 {dimension_numbers = #tpu.dot_dimension_numbers<[1], [1], [0], [0], [0, 0, 1, 0], [], []>} : vector<8x8xbf16>, vector<8x8xbf16>, vector<8x8xf32> -> vector<8x8xf32>
    %82 = arith.addf %81, %8 : vector<8x8xf32>
    %cst_64 = arith.constant dense<0xFF800000> : vector<8xf32>
    %83 = vector.multi_reduction <maximumf>, %82, %cst_64 [1] : vector<8x8xf32> to vector<8xf32>
    %84 = vector.shape_cast %83 : vector<8xf32> to vector<8x1xf32>
    %85 = vector.broadcast %84 : vector<8x1xf32> to vector<8x8xf32>
    %86 = arith.subf %82, %85 : vector<8x8xf32>
    %87 = math.exp %86 : vector<8x8xf32>
    %cst_65 = arith.constant dense<0.000000e+00> : vector<8xf32>
    %88 = vector.multi_reduction <add>, %87, %cst_65 [1] : vector<8x8xf32> to vector<8xf32>
    %89 = vector.shape_cast %88 : vector<8xf32> to vector<8x1xf32>
    %cst_66 = arith.constant 1.000000e+00 : f32
    %90 = vector.broadcast %cst_66 : f32 to vector<8x1xf32>
    %91 = arith.divf %90, %89 : vector<8x1xf32>
    %92 = vector.broadcast %91 : vector<8x1xf32> to vector<8x8xf32>
    %93 = arith.mulf %87, %92 : vector<8x8xf32>
    %94 = arith.truncf %93 : vector<8x8xf32> to vector<8x8xbf16>
    %c0_67 = arith.constant 0 : index
    %c1_68 = arith.constant 1 : index
    %c0_69 = arith.constant 0 : index
    %c0_70 = arith.constant 0 : index
    %95 = vector.load %arg17[%c0_67, %c1_68, %c0_69, %c0_70] : memref<1x4x8x8xbf16, #tpu.memory_space<vmem>>, vector<1x1x8x8xbf16>
    %96 = vector.shape_cast %95 : vector<1x1x8x8xbf16> to vector<8x8xbf16>
    %97 = vector.shape_cast %94 : vector<8x8xbf16> to vector<1x1x8x8xbf16>
    tpu.vector_store %arg17[%c0_67, %c1_68, %c0_69, %c0_70], %97 {strides = array<i32>} : memref<1x4x8x8xbf16, #tpu.memory_space<vmem>>, vector<1x1x8x8xbf16>,
    %98 = arith.truncf %93 : vector<8x8xf32> to vector<8x8xbf16>
    %99 = arith.truncf %78 : vector<8x8xf32> to vector<8x8xbf16>
    %cst_71 = arith.constant dense<0.000000e+00> : vector<8x8xf32>
    %100 = tpu.matmul %98, %99, %cst_71 {dimension_numbers = #tpu.dot_dimension_numbers<[1], [0], [0], [1], [0, 0, 1, 1], [], []>} : vector<8x8xbf16>, vector<8x8xbf16>, vector<8x8xf32> -> vector<8x8xf32>
    %101 = arith.truncf %100 : vector<8x8xf32> to vector<8x8xbf16>
    %c1_72 = arith.constant 1 : index
    %c0_73 = arith.constant 0 : index
    %c0_74 = arith.constant 0 : index
    %102 = vector.load %arg12[%c1_72, %c0_73, %c0_74] : memref<4x8x32xbf16, #tpu.memory_space<vmem>>, vector<1x8x32xbf16>
    %103 = vector.shape_cast %102 : vector<1x8x32xbf16> to vector<8x32xbf16>
    %cst_75 = arith.constant dense<0.000000e+00> : vector<8x32xf32>
    %104 = tpu.matmul %101, %103, %cst_75 {dimension_numbers = #tpu.dot_dimension_numbers<[1], [0], [0], [1], [0, 0, 1, 1], [], []>} : vector<8x8xbf16>, vector<8x32xbf16>, vector<8x32xf32> -> vector<8x32xf32>
    %105 = arith.addf %57, %104 : vector<8x32xf32>
    %c2 = arith.constant 2 : index
    %c0_76 = arith.constant 0 : index
    %c0_77 = arith.constant 0 : index
    %106 = vector.load %arg6[%c2, %c0_76, %c0_77] : memref<4x32x8xbf16, #tpu.memory_space<vmem>>, vector<1x32x8xbf16>
    %107 = vector.shape_cast %106 : vector<1x32x8xbf16> to vector<32x8xbf16>
    %cst_78 = arith.constant dense<0.000000e+00> : vector<8x8xf32>
    %108 = tpu.matmul %1, %107, %cst_78 {dimension_numbers = #tpu.dot_dimension_numbers<[1], [0], [0], [1], [0, 0, 1, 1], [], []>} : vector<8x32xbf16>, vector<32x8xbf16>, vector<8x8xf32> -> vector<8x8xf32>
    %c2_79 = arith.constant 2 : index
    %c0_80 = arith.constant 0 : index
    %c0_81 = arith.constant 0 : index
    %109 = vector.load %arg7[%c2_79, %c0_80, %c0_81] : memref<4x1x8xf32, #tpu.memory_space<vmem>>, vector<1x1x8xf32>
    %110 = vector.shape_cast %109 : vector<1x1x8xf32> to vector<1x8xf32>
    %111 = vector.broadcast %110 : vector<1x8xf32> to vector<8x8xf32>
    %112 = arith.addf %108, %111 : vector<8x8xf32>
    %c2_82 = arith.constant 2 : index
    %c0_83 = arith.constant 0 : index
    %c0_84 = arith.constant 0 : index
    %113 = vector.load %arg8[%c2_82, %c0_83, %c0_84] : memref<4x32x8xbf16, #tpu.memory_space<vmem>>, vector<1x32x8xbf16>
    %114 = vector.shape_cast %113 : vector<1x32x8xbf16> to vector<32x8xbf16>
    %cst_85 = arith.constant dense<0.000000e+00> : vector<8x8xf32>
    %115 = tpu.matmul %3, %114, %cst_85 {dimension_numbers = #tpu.dot_dimension_numbers<[1], [0], [0], [1], [0, 0, 1, 1], [], []>} : vector<8x32xbf16>, vector<32x8xbf16>, vector<8x8xf32> -> vector<8x8xf32>
    %c2_86 = arith.constant 2 : index
    %c0_87 = arith.constant 0 : index
    %c0_88 = arith.constant 0 : index
    %116 = vector.load %arg9[%c2_86, %c0_87, %c0_88] : memref<4x1x8xf32, #tpu.memory_space<vmem>>, vector<1x1x8xf32>
    %117 = vector.shape_cast %116 : vector<1x1x8xf32> to vector<1x8xf32>
    %118 = vector.broadcast %117 : vector<1x8xf32> to vector<8x8xf32>
    %119 = arith.addf %115, %118 : vector<8x8xf32>
    %c2_89 = arith.constant 2 : index
    %c0_90 = arith.constant 0 : index
    %c0_91 = arith.constant 0 : index
    %120 = vector.load %arg10[%c2_89, %c0_90, %c0_91] : memref<4x32x8xbf16, #tpu.memory_space<vmem>>, vector<1x32x8xbf16>
    %121 = vector.shape_cast %120 : vector<1x32x8xbf16> to vector<32x8xbf16>
    %cst_92 = arith.constant dense<0.000000e+00> : vector<8x8xf32>
    %122 = tpu.matmul %3, %121, %cst_92 {dimension_numbers = #tpu.dot_dimension_numbers<[1], [0], [0], [1], [0, 0, 1, 1], [], []>} : vector<8x32xbf16>, vector<32x8xbf16>, vector<8x8xf32> -> vector<8x8xf32>
    %c2_93 = arith.constant 2 : index
    %c0_94 = arith.constant 0 : index
    %c0_95 = arith.constant 0 : index
    %123 = vector.load %arg11[%c2_93, %c0_94, %c0_95] : memref<4x1x8xf32, #tpu.memory_space<vmem>>, vector<1x1x8xf32>
    %124 = vector.shape_cast %123 : vector<1x1x8xf32> to vector<1x8xf32>
    %125 = vector.broadcast %124 : vector<1x8xf32> to vector<8x8xf32>
    %126 = arith.addf %122, %125 : vector<8x8xf32>
    %127 = arith.truncf %112 : vector<8x8xf32> to vector<8x8xbf16>
    %128 = arith.truncf %119 : vector<8x8xf32> to vector<8x8xbf16>
    %cst_96 = arith.constant dense<0.000000e+00> : vector<8x8xf32>
    %129 = tpu.matmul %127, %128, %cst_96 {dimension_numbers = #tpu.dot_dimension_numbers<[1], [1], [0], [0], [0, 0, 1, 0], [], []>} : vector<8x8xbf16>, vector<8x8xbf16>, vector<8x8xf32> -> vector<8x8xf32>
    %130 = arith.addf %129, %8 : vector<8x8xf32>
    %cst_97 = arith.constant dense<0xFF800000> : vector<8xf32>
    %131 = vector.multi_reduction <maximumf>, %130, %cst_97 [1] : vector<8x8xf32> to vector<8xf32>
    %132 = vector.shape_cast %131 : vector<8xf32> to vector<8x1xf32>
    %133 = vector.broadcast %132 : vector<8x1xf32> to vector<8x8xf32>
    %134 = arith.subf %130, %133 : vector<8x8xf32>
    %135 = math.exp %134 : vector<8x8xf32>
    %cst_98 = arith.constant dense<0.000000e+00> : vector<8xf32>
    %136 = vector.multi_reduction <add>, %135, %cst_98 [1] : vector<8x8xf32> to vector<8xf32>
    %137 = vector.shape_cast %136 : vector<8xf32> to vector<8x1xf32>
    %cst_99 = arith.constant 1.000000e+00 : f32
    %138 = vector.broadcast %cst_99 : f32 to vector<8x1xf32>
    %139 = arith.divf %138, %137 : vector<8x1xf32>
    %140 = vector.broadcast %139 : vector<8x1xf32> to vector<8x8xf32>
    %141 = arith.mulf %135, %140 : vector<8x8xf32>
    %142 = arith.truncf %141 : vector<8x8xf32> to vector<8x8xbf16>
    %c0_100 = arith.constant 0 : index
    %c2_101 = arith.constant 2 : index
    %c0_102 = arith.constant 0 : index
    %c0_103 = arith.constant 0 : index
    %143 = vector.load %arg17[%c0_100, %c2_101, %c0_102, %c0_103] : memref<1x4x8x8xbf16, #tpu.memory_space<vmem>>, vector<1x1x8x8xbf16>
    %144 = vector.shape_cast %143 : vector<1x1x8x8xbf16> to vector<8x8xbf16>
    %145 = vector.shape_cast %142 : vector<8x8xbf16> to vector<1x1x8x8xbf16>
    tpu.vector_store %arg17[%c0_100, %c2_101, %c0_102, %c0_103], %145 {strides = array<i32>} : memref<1x4x8x8xbf16, #tpu.memory_space<vmem>>, vector<1x1x8x8xbf16>,
    %146 = arith.truncf %141 : vector<8x8xf32> to vector<8x8xbf16>
    %147 = arith.truncf %126 : vector<8x8xf32> to vector<8x8xbf16>
    %cst_104 = arith.constant dense<0.000000e+00> : vector<8x8xf32>
    %148 = tpu.matmul %146, %147, %cst_104 {dimension_numbers = #tpu.dot_dimension_numbers<[1], [0], [0], [1], [0, 0, 1, 1], [], []>} : vector<8x8xbf16>, vector<8x8xbf16>, vector<8x8xf32> -> vector<8x8xf32>
    %149 = arith.truncf %148 : vector<8x8xf32> to vector<8x8xbf16>
    %c2_105 = arith.constant 2 : index
    %c0_106 = arith.constant 0 : index
    %c0_107 = arith.constant 0 : index
    %150 = vector.load %arg12[%c2_105, %c0_106, %c0_107] : memref<4x8x32xbf16, #tpu.memory_space<vmem>>, vector<1x8x32xbf16>
    %151 = vector.shape_cast %150 : vector<1x8x32xbf16> to vector<8x32xbf16>
    %cst_108 = arith.constant dense<0.000000e+00> : vector<8x32xf32>
    %152 = tpu.matmul %149, %151, %cst_108 {dimension_numbers = #tpu.dot_dimension_numbers<[1], [0], [0], [1], [0, 0, 1, 1], [], []>} : vector<8x8xbf16>, vector<8x32xbf16>, vector<8x32xf32> -> vector<8x32xf32>
    %153 = arith.addf %105, %152 : vector<8x32xf32>
    %c3 = arith.constant 3 : index
    %c0_109 = arith.constant 0 : index
    %c0_110 = arith.constant 0 : index
    %154 = vector.load %arg6[%c3, %c0_109, %c0_110] : memref<4x32x8xbf16, #tpu.memory_space<vmem>>, vector<1x32x8xbf16>
    %155 = vector.shape_cast %154 : vector<1x32x8xbf16> to vector<32x8xbf16>
    %cst_111 = arith.constant dense<0.000000e+00> : vector<8x8xf32>
    %156 = tpu.matmul %1, %155, %cst_111 {dimension_numbers = #tpu.dot_dimension_numbers<[1], [0], [0], [1], [0, 0, 1, 1], [], []>} : vector<8x32xbf16>, vector<32x8xbf16>, vector<8x8xf32> -> vector<8x8xf32>
    %c3_112 = arith.constant 3 : index
    %c0_113 = arith.constant 0 : index
    %c0_114 = arith.constant 0 : index
    %157 = vector.load %arg7[%c3_112, %c0_113, %c0_114] : memref<4x1x8xf32, #tpu.memory_space<vmem>>, vector<1x1x8xf32>
    %158 = vector.shape_cast %157 : vector<1x1x8xf32> to vector<1x8xf32>
    %159 = vector.broadcast %158 : vector<1x8xf32> to vector<8x8xf32>
    %160 = arith.addf %156, %159 : vector<8x8xf32>
    %c3_115 = arith.constant 3 : index
    %c0_116 = arith.constant 0 : index
    %c0_117 = arith.constant 0 : index
    %161 = vector.load %arg8[%c3_115, %c0_116, %c0_117] : memref<4x32x8xbf16, #tpu.memory_space<vmem>>, vector<1x32x8xbf16>
    %162 = vector.shape_cast %161 : vector<1x32x8xbf16> to vector<32x8xbf16>
    %cst_118 = arith.constant dense<0.000000e+00> : vector<8x8xf32>
    %163 = tpu.matmul %3, %162, %cst_118 {dimension_numbers = #tpu.dot_dimension_numbers<[1], [0], [0], [1], [0, 0, 1, 1], [], []>} : vector<8x32xbf16>, vector<32x8xbf16>, vector<8x8xf32> -> vector<8x8xf32>
    %c3_119 = arith.constant 3 : index
    %c0_120 = arith.constant 0 : index
    %c0_121 = arith.constant 0 : index
    %164 = vector.load %arg9[%c3_119, %c0_120, %c0_121] : memref<4x1x8xf32, #tpu.memory_space<vmem>>, vector<1x1x8xf32>
    %165 = vector.shape_cast %164 : vector<1x1x8xf32> to vector<1x8xf32>
    %166 = vector.broadcast %165 : vector<1x8xf32> to vector<8x8xf32>
    %167 = arith.addf %163, %166 : vector<8x8xf32>
    %c3_122 = arith.constant 3 : index
    %c0_123 = arith.constant 0 : index
    %c0_124 = arith.constant 0 : index
    %168 = vector.load %arg10[%c3_122, %c0_123, %c0_124] : memref<4x32x8xbf16, #tpu.memory_space<vmem>>, vector<1x32x8xbf16>
    %169 = vector.shape_cast %168 : vector<1x32x8xbf16> to vector<32x8xbf16>
    %cst_125 = arith.constant dense<0.000000e+00> : vector<8x8xf32>
    %170 = tpu.matmul %3, %169, %cst_125 {dimension_numbers = #tpu.dot_dimension_numbers<[1], [0], [0], [1], [0, 0, 1, 1], [], []>} : vector<8x32xbf16>, vector<32x8xbf16>, vector<8x8xf32> -> vector<8x8xf32>
    %c3_126 = arith.constant 3 : index
    %c0_127 = arith.constant 0 : index
    %c0_128 = arith.constant 0 : index
    %171 = vector.load %arg11[%c3_126, %c0_127, %c0_128] : memref<4x1x8xf32, #tpu.memory_space<vmem>>, vector<1x1x8xf32>
    %172 = vector.shape_cast %171 : vector<1x1x8xf32> to vector<1x8xf32>
    %173 = vector.broadcast %172 : vector<1x8xf32> to vector<8x8xf32>
    %174 = arith.addf %170, %173 : vector<8x8xf32>
    %175 = arith.truncf %160 : vector<8x8xf32> to vector<8x8xbf16>
    %176 = arith.truncf %167 : vector<8x8xf32> to vector<8x8xbf16>
    %cst_129 = arith.constant dense<0.000000e+00> : vector<8x8xf32>
    %177 = tpu.matmul %175, %176, %cst_129 {dimension_numbers = #tpu.dot_dimension_numbers<[1], [1], [0], [0], [0, 0, 1, 0], [], []>} : vector<8x8xbf16>, vector<8x8xbf16>, vector<8x8xf32> -> vector<8x8xf32>
    %178 = arith.addf %177, %8 : vector<8x8xf32>
    %cst_130 = arith.constant dense<0xFF800000> : vector<8xf32>
    %179 = vector.multi_reduction <maximumf>, %178, %cst_130 [1] : vector<8x8xf32> to vector<8xf32>
    %180 = vector.shape_cast %179 : vector<8xf32> to vector<8x1xf32>
    %181 = vector.broadcast %180 : vector<8x1xf32> to vector<8x8xf32>
    %182 = arith.subf %178, %181 : vector<8x8xf32>
    %183 = math.exp %182 : vector<8x8xf32>
    %cst_131 = arith.constant dense<0.000000e+00> : vector<8xf32>
    %184 = vector.multi_reduction <add>, %183, %cst_131 [1] : vector<8x8xf32> to vector<8xf32>
    %185 = vector.shape_cast %184 : vector<8xf32> to vector<8x1xf32>
    %cst_132 = arith.constant 1.000000e+00 : f32
    %186 = vector.broadcast %cst_132 : f32 to vector<8x1xf32>
    %187 = arith.divf %186, %185 : vector<8x1xf32>
    %188 = vector.broadcast %187 : vector<8x1xf32> to vector<8x8xf32>
    %189 = arith.mulf %183, %188 : vector<8x8xf32>
    %190 = arith.truncf %189 : vector<8x8xf32> to vector<8x8xbf16>
    %c0_133 = arith.constant 0 : index
    %c3_134 = arith.constant 3 : index
    %c0_135 = arith.constant 0 : index
    %c0_136 = arith.constant 0 : index
    %191 = vector.load %arg17[%c0_133, %c3_134, %c0_135, %c0_136] : memref<1x4x8x8xbf16, #tpu.memory_space<vmem>>, vector<1x1x8x8xbf16>
    %192 = vector.shape_cast %191 : vector<1x1x8x8xbf16> to vector<8x8xbf16>
    %193 = vector.shape_cast %190 : vector<8x8xbf16> to vector<1x1x8x8xbf16>
    tpu.vector_store %arg17[%c0_133, %c3_134, %c0_135, %c0_136], %193 {strides = array<i32>} : memref<1x4x8x8xbf16, #tpu.memory_space<vmem>>, vector<1x1x8x8xbf16>,
    %194 = arith.truncf %189 : vector<8x8xf32> to vector<8x8xbf16>
    %195 = arith.truncf %174 : vector<8x8xf32> to vector<8x8xbf16>
    %cst_137 = arith.constant dense<0.000000e+00> : vector<8x8xf32>
    %196 = tpu.matmul %194, %195, %cst_137 {dimension_numbers = #tpu.dot_dimension_numbers<[1], [0], [0], [1], [0, 0, 1, 1], [], []>} : vector<8x8xbf16>, vector<8x8xbf16>, vector<8x8xf32> -> vector<8x8xf32>
    %197 = arith.truncf %196 : vector<8x8xf32> to vector<8x8xbf16>
    %c3_138 = arith.constant 3 : index
    %c0_139 = arith.constant 0 : index
    %c0_140 = arith.constant 0 : index
    %198 = vector.load %arg12[%c3_138, %c0_139, %c0_140] : memref<4x8x32xbf16, #tpu.memory_space<vmem>>, vector<1x8x32xbf16>
    %199 = vector.shape_cast %198 : vector<1x8x32xbf16> to vector<8x32xbf16>
    %cst_141 = arith.constant dense<0.000000e+00> : vector<8x32xf32>
    %200 = tpu.matmul %197, %199, %cst_141 {dimension_numbers = #tpu.dot_dimension_numbers<[1], [0], [0], [1], [0, 0, 1, 1], [], []>} : vector<8x8xbf16>, vector<8x32xbf16>, vector<8x32xf32> -> vector<8x32xf32>
    %201 = arith.addf %153, %200 : vector<8x32xf32>
    %c0_142 = arith.constant 0 : index
    %c0_143 = arith.constant 0 : index
    %202 = vector.load %arg13[%c0_142, %c0_143] : memref<1x32xf32, #tpu.memory_space<vmem>>, vector<1x32xf32>
    %203 = vector.broadcast %202 : vector<1x32xf32> to vector<8x32xf32>
    %204 = arith.addf %201, %203 : vector<8x32xf32>
    %205 = arith.extf %1 : vector<8x32xbf16> to vector<8x32xf32>
    %206 = arith.addf %204, %205 : vector<8x32xf32>
    %cst_144 = arith.constant dense<0.000000e+00> : vector<8xf32>
    %207 = vector.multi_reduction <add>, %206, %cst_144 [1] : vector<8x32xf32> to vector<8xf32>
    %208 = vector.shape_cast %207 : vector<8xf32> to vector<8x1xf32>
    %cst_145 = arith.constant 3.200000e+01 : f32
    %209 = vector.broadcast %cst_145 : f32 to vector<8x1xf32>
    %210 = arith.divf %208, %209 : vector<8x1xf32>
    %211 = vector.broadcast %210 : vector<8x1xf32> to vector<8x32xf32>
    %212 = arith.subf %206, %211 : vector<8x32xf32>
    %213 = arith.mulf %212, %212 : vector<8x32xf32>
    %cst_146 = arith.constant dense<0.000000e+00> : vector<8xf32>
    %214 = vector.multi_reduction <add>, %213, %cst_146 [1] : vector<8x32xf32> to vector<8xf32>
    %215 = vector.shape_cast %214 : vector<8xf32> to vector<8x1xf32>
    %cst_147 = arith.constant 3.200000e+01 : f32
    %216 = vector.broadcast %cst_147 : f32 to vector<8x1xf32>
    %217 = arith.divf %215, %216 : vector<8x1xf32>
    %218 = vector.broadcast %210 : vector<8x1xf32> to vector<8x32xf32>
    %219 = arith.subf %206, %218 : vector<8x32xf32>
    %cst_148 = arith.constant 9.99999974E-6 : f32
    %220 = vector.broadcast %cst_148 : f32 to vector<8x1xf32>
    %221 = arith.addf %217, %220 : vector<8x1xf32>
    %222 = math.rsqrt %221 : vector<8x1xf32>
    %223 = vector.broadcast %222 : vector<8x1xf32> to vector<8x32xf32>
    %224 = arith.mulf %219, %223 : vector<8x32xf32>
    %c0_149 = arith.constant 0 : index
    %c0_150 = arith.constant 0 : index
    %225 = vector.load %arg14[%c0_149, %c0_150] : memref<1x32xf32, #tpu.memory_space<vmem>>, vector<1x32xf32>
    %226 = vector.broadcast %225 : vector<1x32xf32> to vector<8x32xf32>
    %227 = arith.mulf %224, %226 : vector<8x32xf32>
    %c0_151 = arith.constant 0 : index
    %c0_152 = arith.constant 0 : index
    %228 = vector.load %arg15[%c0_151, %c0_152] : memref<1x32xf32, #tpu.memory_space<vmem>>, vector<1x32xf32>
    %229 = vector.broadcast %228 : vector<1x32xf32> to vector<8x32xf32>
    %230 = arith.addf %227, %229 : vector<8x32xf32>
    %c0_153 = arith.constant 0 : index
    %c0_154 = arith.constant 0 : index
    %c0_155 = arith.constant 0 : index
    %231 = vector.load %arg4[%c0_153, %c0_154, %c0_155] : memref<1x8x1xf32, #tpu.memory_space<vmem>>, vector<1x8x1xf32>
    %232 = vector.shape_cast %231 : vector<1x8x1xf32> to vector<8x1xf32>
    %233 = vector.broadcast %232 : vector<8x1xf32> to vector<8x32xf32>
    %234 = arith.mulf %230, %233 : vector<8x32xf32>
    %235 = arith.truncf %234 : vector<8x32xf32> to vector<8x32xbf16>
    %c0_156 = arith.constant 0 : index
    %c0_157 = arith.constant 0 : index
    %c0_158 = arith.constant 0 : index
    %236 = vector.load %arg16[%c0_156, %c0_157, %c0_158] : memref<1x8x32xbf16, #tpu.memory_space<vmem>>, vector<1x8x32xbf16>
    %237 = vector.shape_cast %236 : vector<1x8x32xbf16> to vector<8x32xbf16>
    %238 = vector.shape_cast %235 : vector<8x32xbf16> to vector<1x8x32xbf16>
    tpu.vector_store %arg16[%c0_156, %c0_157, %c0_158], %238 {strides = array<i32>} : memref<1x8x32xbf16, #tpu.memory_space<vmem>>, vector<1x8x32xbf16>,
    return
  }
  func.func @transform_0(%arg0: i32, %arg1: i32) -> (i32, i32, i32) {
    %c0_i32 = arith.constant 0 : i32
    %c0_i32_0 = arith.constant 0 : i32
    return %arg0, %arg1, %c0_i32 : i32, i32, i32
  }
  func.func @transform_1(%arg0: i32, %arg1: i32) -> (i32, i32, i32) {
    %c0_i32 = arith.constant 0 : i32
    %c0_i32_0 = arith.constant 0 : i32
    %c0_i32_1 = arith.constant 0 : i32
    return %arg0, %c0_i32, %c0_i32_0 : i32, i32, i32
  }
  func.func @transform_2(%arg0: i32, %arg1: i32) -> (i32, i32, i32) {
    %c0_i32 = arith.constant 0 : i32
    %c0_i32_0 = arith.constant 0 : i32
    return %arg0, %arg1, %c0_i32 : i32, i32, i32
  }
  func.func @transform_3(%arg0: i32, %arg1: i32) -> (i32, i32, i32) {
    %c0_i32 = arith.constant 0 : i32
    %c0_i32_0 = arith.constant 0 : i32
    return %arg0, %arg1, %c0_i32 : i32, i32, i32
  }
  func.func @transform_4(%arg0: i32, %arg1: i32) -> (i32, i32, i32) {
    %c0_i32 = arith.constant 0 : i32
    %c0_i32_0 = arith.constant 0 : i32
    %c0_i32_1 = arith.constant 0 : i32
    %c0_i32_2 = arith.constant 0 : i32
    return %c0_i32, %c0_i32_0, %c0_i32_1 : i32, i32, i32
  }
  func.func @transform_5(%arg0: i32, %arg1: i32) -> (i32, i32, i32) {
    %c0_i32 = arith.constant 0 : i32
    %c0_i32_0 = arith.constant 0 : i32
    %c0_i32_1 = arith.constant 0 : i32
    %c0_i32_2 = arith.constant 0 : i32
    return %c0_i32, %c0_i32_0, %c0_i32_1 : i32, i32, i32
  }
  func.func @transform_6(%arg0: i32, %arg1: i32) -> (i32, i32, i32) {
    %c0_i32 = arith.constant 0 : i32
    %c0_i32_0 = arith.constant 0 : i32
    %c0_i32_1 = arith.constant 0 : i32
    %c0_i32_2 = arith.constant 0 : i32
    return %c0_i32, %c0_i32_0, %c0_i32_1 : i32, i32, i32
  }
  func.func @transform_7(%arg0: i32, %arg1: i32) -> (i32, i32, i32) {
    %c0_i32 = arith.constant 0 : i32
    %c0_i32_0 = arith.constant 0 : i32
    %c0_i32_1 = arith.constant 0 : i32
    %c0_i32_2 = arith.constant 0 : i32
    return %c0_i32, %c0_i32_0, %c0_i32_1 : i32, i32, i32
  }
  func.func @transform_8(%arg0: i32, %arg1: i32) -> (i32, i32, i32) {
    %c0_i32 = arith.constant 0 : i32
    %c0_i32_0 = arith.constant 0 : i32
    %c0_i32_1 = arith.constant 0 : i32
    %c0_i32_2 = arith.constant 0 : i32
    return %c0_i32, %c0_i32_0, %c0_i32_1 : i32, i32, i32
  }
  func.func @transform_9(%arg0: i32, %arg1: i32) -> (i32, i32, i32) {
    %c0_i32 = arith.constant 0 : i32
    %c0_i32_0 = arith.constant 0 : i32
    %c0_i32_1 = arith.constant 0 : i32
    %c0_i32_2 = arith.constant 0 : i32
    return %c0_i32, %c0_i32_0, %c0_i32_1 : i32, i32, i32
  }
  func.func @transform_10(%arg0: i32, %arg1: i32) -> (i32, i32, i32) {
    %c0_i32 = arith.constant 0 : i32
    %c0_i32_0 = arith.constant 0 : i32
    %c0_i32_1 = arith.constant 0 : i32
    %c0_i32_2 = arith.constant 0 : i32
    return %c0_i32, %c0_i32_0, %c0_i32_1 : i32, i32, i32
  }
  func.func @transform_11(%arg0: i32, %arg1: i32) -> (i32, i32) {
    %c0_i32 = arith.constant 0 : i32
    %c0_i32_0 = arith.constant 0 : i32
    %c0_i32_1 = arith.constant 0 : i32
    return %c0_i32, %c0_i32_0 : i32, i32
  }
  func.func @transform_12(%arg0: i32, %arg1: i32) -> (i32, i32) {
    %c0_i32 = arith.constant 0 : i32
    %c0_i32_0 = arith.constant 0 : i32
    %c0_i32_1 = arith.constant 0 : i32
    return %c0_i32, %c0_i32_0 : i32, i32
  }
  func.func @transform_13(%arg0: i32, %arg1: i32) -> (i32, i32) {
    %c0_i32 = arith.constant 0 : i32
    %c0_i32_0 = arith.constant 0 : i32
    %c0_i32_1 = arith.constant 0 : i32
    return %c0_i32, %c0_i32_0 : i32, i32
  }
  func.func @transform_14(%arg0: i32, %arg1: i32) -> (i32, i32, i32) {
    %c0_i32 = arith.constant 0 : i32
    %c0_i32_0 = arith.constant 0 : i32
    return %arg0, %arg1, %c0_i32 : i32, i32, i32
  }
  func.func @transform_15(%arg0: i32, %arg1: i32) -> (i32, i32, i32, i32) {
    %c0_i32 = arith.constant 0 : i32
    %c0_i32_0 = arith.constant 0 : i32
    %c0_i32_1 = arith.constant 0 : i32
    return %arg0, %c0_i32, %arg1, %c0_i32_0 : i32, i32, i32, i32
  }
}

</mosaic_0001>

<bundles_post_ra>
// kernel: tpu_custom_call.1
= control target key start
LH: loop header
LB: loop body
LE: loop exit
PB: predicated region body
PF: predicated region fallthrough
CT: control target
= control target key end

     0   :  { %s3381_s0 = inlined_call_operand.vmem [shape: bf16[2,8,32], index: 0, kind: input, shape index: {}]   ;;  %s3382_s1 = inlined_call_operand.vmem [shape: bf16[2,8,32], index: 1, kind: input, shape index: {}]   ;;  %s3383_s2 = inlined_call_operand.vmem [shape: f32[2,8,1], index: 2, kind: input, shape index: {}]   ;;  %s3384_s3 = inlined_call_operand.vmem [shape: s8[2,8,8], index: 3, kind: input, shape index: {}]   ;;  %s3385_s4 = inlined_call_operand.vmem [shape: bf16[4,32,8], index: 4, kind: input, shape index: {}]   ;;  %s3386_s5 = inlined_call_operand.vmem [shape: f32[4,1,8], index: 5, kind: input, shape index: {}]   ;;  %s3387_s6 = inlined_call_operand.vmem [shape: bf16[4,32,8], index: 6, kind: input, shape index: {}]   ;;  %s3388_s7 = inlined_call_operand.vmem [shape: f32[4,1,8], index: 7, kind: input, shape index: {}]   ;;  %s3389_s8 = inlined_call_operand.vmem [shape: bf16[4,32,8], index: 8, kind: input, shape index: {}]   ;;  %s3390_s9 = inlined_call_operand.vmem [shape: f32[4,1,8], index: 9, kind: input, shape index: {}]   ;;  %s3391_s10 = inlined_call_operand.vmem [shape: bf16[4,8,32], index: 10, kind: input, shape index: {}]   ;;  %s3392_s11 = inlined_call_operand.vmem [shape: f32[1,32], index: 11, kind: input, shape index: {}]   ;;  %s3393_s12 = inlined_call_operand.vmem [shape: f32[1,32], index: 12, kind: input, shape index: {}]   ;;  %s3394_s13 = inlined_call_operand.vmem [shape: f32[1,32], index: 13, kind: input, shape index: {}]   ;;  %s3395_s14 = inlined_call_operand.hbm [shape: bf16[2,8,32], index: 14, kind: output, shape index: {0}]   ;;  %s3396_s15 = inlined_call_operand.hbm [shape: bf16[2,4,8,8], index: 15, kind: output, shape index: {1}]  }
   0x1   :  { %3400 = sst [smem:[#allocation12_spill]] %s3381_s0 }
   0x2   :  { %3401 = sst [smem:[#allocation13_spill]] %s3382_s1 }
   0x3   :  { %3402 = sst [smem:[#allocation14_spill]] %s3383_s2 }
   0x4   :  { %21 = vsyncpa [#allocation3], 0 }
   0x5   :  { %23 = vsyncpa [#allocation3 + $0x1], 0 }
   0x6   :  { %24 = vsyncpa [#allocation5], 0 }
   0x7   :  { %26 = vsyncpa [#allocation5 + $0x1], 0  ;;  %s2926_s18 = smov 0   ;;  %s2928_s19 = smov 0  }
   0x8   :  { %s2930_s20 = smov 0   ;;  %s2932_s21 = smov 0  }
   0x9   :  { %s2934_s22 = smov 0   ;;  %s2936_s23 = smov 0  }
   0xa LB: > { %3403 = sst [smem:[#allocation8_spill]] %s2825_s20  ;;  %s2262_s24 = sadd.s32 4294967295, %s2837_s23   ;;  %s2837_s23 = sphi %s2936_s23, %s32_s23   ;;  %s2833_s22 = sphi %s2934_s22, %s3416_s22   ;;  %s2829_s21 = sphi %s2932_s21, %s3415_s21   ;;  %s2825_s20 = sphi %s2930_s20, %s3414_s20   ;;  %s2821_s19 = sphi %s2928_s19, %s3418_s19   ;;  %s2817_s18 = sphi %s2926_s18, %s3417_s18  }
   0xb   : > { %3404 = sst [smem:[#allocation9_spill]] %s2833_s22  ;;  %s2263_s25 = sadd.s32 4294967294, %s2837_s23  }
   0xc   : > { %s44_s26 = sadd.s32 1, %s2833_s22  ;;  %s373_s27 = sadd.s32 1, %s2825_s20 }
   0xd   : > { %p46_p0 = scmp.ge.s32.totalorder %s44_s26, 2  ;;  %p383_p1 = scmp.ne.s32.totalorder %s2825_s20, %s2821_s19 }
   0xe   : > { %p384_p2 = scmp.eq.s32.totalorder %s2262_s24, 1  ;;  %p389_p3 = scmp.ne.s32.totalorder %s2821_s19, %s2817_s18 }
   0xf   : > { %s3420_s26 = smov (%p46_p0, %s44_s26), 0  ;;  %p390_p5 = scmp.eq.s32.totalorder %s2263_s25, 1 }
  0x10   : > { %3405 = sst [smem:[#allocation10_spill]] %s3420_s26  ;;  %p2966_p4 = por %p384_p2, %p383_p1 }
  0x11   : > { %s368_s29 = ssub.s32 %s2833_s22, %s3420_s26  ;;  %p2266_p6 = scmp.ge.s32.totalorder %s2837_s23, 1 }
  0x12   : > { %p371_p7 = scmp.eq.s32.totalorder %s368_s29, 0  ;;  %p2973_p8 = por %p390_p5, %p389_p3 }
  0x13   : > { %p503_p9 = scmp.lt.s32.totalorder %s2837_s23, 3 }
  0x14   : > { %s2979_s16 = scalar_select %p371_p7, %s2825_s20, %s373_s27  }
  0x15   : > { %p504_p10 = pnand %p2266_p6, %p503_p9 }
  0x16   : > { %3408 = sst [smem:[#allocation11_spill]] %s2979_s16  ;;  %p576_p11 = scmp.lt.s32.totalorder (!%p504_p10), %s2829_s21, 1 }
  0x17   : > { %507 = sbr.rel (%p504_p10) target bundleno = 4018 (0xfb2), region = 76  ;;  %s3409_s1 = sld [smem:[#allocation13_spill]] (!%p504_p10) }
  0x18   : > { %s3410_s0 = sld [smem:[#allocation12_spill]] (!%p504_p10) }
  0x19   : > { %s3411_s2 = sld [smem:[#allocation14_spill]] (!%p504_p10) }
  0x1c   : > { %v2689_v0 = vld [vmem:[%s3387_s6 + $0x8] sm:$0xff]   ;;  %v2839_v1 = vmov 0.0   ;;  %v2691_v3 = vld [vmem:[%s3387_s6] sm:$0xff]   ;;  %vm2840_vm0 = vmmov 0   ;;  %s3001_s25 = scalar_select %p576_p11, %s2829_s21, 1  ;;  %vm631_vm1 = vcmask 261120  }
  0x1d   : > { %2463 = vmatprep.subr.bf16.mxu1 %v2839_v1  ;;  %2455 = vmatprep.subr.bf16.mxu0 %v2839_v1  ;;  %v2690_v2 = vld [vmem:[%s3385_s4 + $0x8] sm:$0xff]   ;;  %v2692_v4 = vld [vmem:[%s3385_s4] sm:$0xff]   ;;  %vm806_vm2 = vcmask 64512   ;;  %vm872_vm3 = vcmask 1043456   ;;  %v2696_v47 = vld [vmem:[%s3385_s4 + $0x18] sm:$0xff]   ;;  %vm866_vm4 = vcmask 60416  }
  0x1e   : > { %2464 = vmatpush3.bf16.msra.mxu1 %v2689_v0  ;;  %2467 = vmatprep.mubr.msk.bf16.mxu1 %vm2840_vm0, %v2839_v1  ;;  %s2269_s26 = sshll.u32 %s3001_s25, 2  ;;  %v2277_v7 = vld [vmem:[%s3388_s7] ss:$0 sm:$0xff]  ;;  %v2693_v22 = vld [vmem:[%s3389_s8 + $0x8] sm:$0xff]   ;;  %s2272_s20 = sshll.u32 %s3001_s25, 1  ;;  %v2698_v48 = vld [vmem:[%s3385_s4 + $0x10] sm:$0xff]  }
  0x1f   : > { %2456 = vmatpush3.bf16.msra.mxu0 %v2690_v2  ;;  %2465 = vmatprep.subr.bf16.mxu1 %v2839_v1  ;;  %s586_s22 = scalar_lea.vmem %s3409_s1, %s2269_s26  ;;  %s582_s17 = scalar_lea.vmem %s3410_s0, %s2269_s26  ;;  %v2273_v11 = vld [vmem:[%s3386_s5] ss:$0 sm:$0xff]  ;;  %v2695_v52 = vld [vmem:[%s3387_s6 + $0x18] sm:$0xff]   ;;  %v2697_v54 = vld [vmem:[%s3387_s6 + $0x10] sm:$0xff]  }
  0x20   : > { %2457 = vmatprep.subr.bf16.mxu0 %v2839_v1  ;;  %2459 = vmatprep.mubr.msk.bf16.mxu0 %vm2840_vm0, %v2839_v1  ;;  %v3013_v5 = vld [vmem:[%s586_s22] sm:$0xf]  ;;  %s600_s24 = scalar_lea.vmem %s3384_s3, %s2272_s20  ;;  %s3076_s22 = sand.u32 1, %s2821_s19  }
  0x21   : > { %v3015_v6 = vld [vmem:[%s582_s17] sm:$0xf]  ;;  %s2271_s26 = sshll.u32 %s3001_s25, 3 }
  0x22   : > { %2466 = vmatpush3.bf16.msra.mxu1 %v2691_v3  ;;  %v2694_v23 = vld [vmem:[%s3389_s8] sm:$0xff]   ;;  %s593_s20 = scalar_lea.vmem %s3411_s2, %s2271_s26 }
  0x23   : > { %2458 = vmatpush3.bf16.msra.mxu0 %v2692_v4  ;;  %2479 = vmatprep.subr.bf16.mxu1 %v2839_v1  ;;  %v604_v24 = vld [vmem:[%s600_s24] sm:$0x3]  ;;  %s2268_s24 = sshll.u32 %s3076_s22, 4 }
  0x24   : > { %2471 = vmatprep.subr.bf16.mxu0 %v2839_v1  ;;  %v605_v25 = vunpack.c.0.s8 %v604_v24  ;;  %v2281_v39 = vld [vmem:[%s3390_s9] ss:$0 sm:$0xff]  ;;  %s3083_s27 = scalar_lea.vmem [#allocation4], %s2268_s24  ;;  %v2301_v63 = vld [vmem:[%s3388_s7 + $0x1] ss:$0 sm:$0xff]  ;;  %s2394_s24 = sshll.u32 %s2829_s21, 8 }
  0x25   : > { %2468 = vmatmul.mubr.msk.bf16.vlgmr.msra.gmra.mxu1 %vm631_vm1, %v3013_v5  ;;  %v2292_v3 = vld [vmem:[%s3386_s5 + $0x1] ss:$0 sm:$0xff]  ;;  %s2112_s16 = sshll.u32 %s3083_s27, 4  ;;  %s3310_s26 = scalar_lea.hbm %s3396_s15, %s2394_s24  ;;  %s3305_s16 = int_to_ptr.vmem [resolvable:$true] %s2112_s16 }
  0x26   : > { %2460 = vmatmul.mubr.msk.bf16.vlgmr.msra.gmra.mxu0 %vm631_vm1, %v3015_v6  ;;  %2481 = vmatprep.mubr.msk.bf16.mxu1 %vm2840_vm0, %v2839_v1  ;;  %v606_v26 = vcvt.s32.f32 %v605_v25  ;;  %s2731_s17 = scalar_lea.vmem %s3305_s16, 256 }
  0x27   : > { %2475 = vmatprep.mubr.msk.bf16.mxu0 %vm2840_vm0, %v2839_v1  ;;  %2472 = vmatpush3.bf16.msra.mxu0 %v2693_v22  ;;  %p2732_p12 = scmp.ne.s32.totalorder %s3305_s16, %s2731_s17 }
  0x28   : > { %2473 = vmatprep.subr.bf16.mxu0 %v2839_v1  ;;  %v3053_v27 = vmul.f32 -1e+10, %v606_v26 }
  0x29   : > { %p2733_p13 = pnand %p2732_p12, %p2966_p4 }
  0x2b   : > { %2474 = vmatpush3.bf16.msra.mxu0 %v2694_v23  ;;  %p2734_p0 = pneg %p2733_p13 }
  0x2c   : > { %2485 = vmatprep.subr.bf16.mxu0 %v2839_v1 }
  0x2e   : > { %2476 = vmatmul.mubr.msk.bf16.vlgmr.msra.gmra.mxu0 %vm631_vm1, %v3013_v5 }
  0x2f   : > { %2487 = vmatprep.mubr.msk.bf16.mxu0 %vm2840_vm0, %v2839_v1 }
  0xe5   : > { %v735_v8 = vpop.f32.mrf.mxu1 }
  0xe6   : > { %v736_v9 = vadd.f32 %v2277_v7, %v735_v8  ;;  %v669_v10 = vpop.f32.mrf.mxu0 }
  0xe7   : > { %v2469_v12 = vpop.f32.mrf.mxu1  ;;  %v670_v17 = vadd.f32 %v2273_v11, %v669_v10 }
  0xe8   : > { %v805_v13 = vpack.c.bf16 %v736_v9, %v736_v9  ;;  %v2461_v14 = vpop.f32.mrf.mxu0 }
  0xe9   : > { %v738_v15 = vpop.f32.mrf.mxu1  ;;  %v804_v21 = vpack.c.bf16 %v670_v17, %v670_v17  ;;  %v2700_v14 = vld [vmem:[%s3389_s8 + $0x10] sm:$0xff]  }
  0xea   : > { %v811_v16 = vsel %vm806_vm2, %v805_v13, 0  ;;  %v672_v18 = vpop.f32.mrf.mxu0  ;;  %v2699_v13 = vld [vmem:[%s3389_s8 + $0x18] sm:$0xff]  }
  0xeb   : > { %v2470_v19 = vpop.f32.mrf.mxu1  ;;  %2480 = vmatpush3.bf16.xpose.msra.mxu1 %v811_v16 }
  0xec   : > { %v2462_v20 = vpop.f32.mrf.mxu0  ;;  %2491 = vmatprep.subr.bf16.mxu1 %v2839_v1 }
  0xee   : > { %v798_v40 = vpop.f32.mrf.mxu0 }
  0xef   : > { %v799_v41 = vadd.f32 %v2281_v39, %v798_v40  ;;  %v917_v39 = vld [vmem:[%s3391_s10] sm:$0xf] }
  0xf0   : > { %v2477_v42 = vpop.f32.mrf.mxu0 }
  0xf1   : > { %v868_v43 = vpack.c.bf16 %v799_v41, %v799_v41  ;;  %v1276_v42 = vsel %vm872_vm3, %v917_v39, 0 }
  0xf2   : > { %2482 = vmatmul.mubr.msk.bf16.vlgmr.msra.gmra.mxu1 %vm806_vm2, %v804_v21  ;;  %v801_v44 = vpop.f32.mrf.mxu0  ;;  %v2310_v21 = vld [vmem:[%s3390_s9 + $0x1] ss:$0 sm:$0xff] }
  0xf3   : > { %2495 = vmatprep.mubr.msk.bf16.mxu1 %vm2840_vm0, %v2839_v1  ;;  %v874_v45 = vsel %vm872_vm3, %v868_v43, 0  ;;  %2492 = vmatpush3.bf16.msra.mxu1 %v2696_v47  ;;  %v2701_v43 = vld [vmem:[%s3387_s6 + $0x28] sm:$0xff]  }
  0xf4   : > { %v2478_v46 = vpop.f32.mrf.mxu0  ;;  %2486 = vmatpush3.bf16.msra.mxu0 %v874_v45  ;;  %2493 = vmatprep.subr.bf16.mxu1 %v2839_v1  ;;  %v2702_v45 = vld [vmem:[%s3387_s6 + $0x20] sm:$0xff]   ;;  %v2703_v47 = vld [vmem:[%s3385_s4 + $0x28] sm:$0xff]  }
  0xf5   : > { %2499 = vmatprep.subr.bf16.mxu0 %v2839_v1 }
  0xf7   : > { %2494 = vmatpush3.bf16.msra.mxu1 %v2698_v48 }
  0xf8   : > { %2507 = vmatprep.subr.bf16.mxu1 %v2839_v1 }
  0xfa   : > { %2496 = vmatmul.mubr.msk.bf16.vlgmr.msra.gmra.mxu1 %vm631_vm1, %v3015_v6 }
  0xfb   : > { %2511 = vmatprep.mubr.msk.bf16.mxu1 %vm2840_vm0, %v2839_v1  ;;  %2508 = vmatpush3.bf16.msra.mxu1 %v2699_v13 }
  0xfc   : > { %2509 = vmatprep.subr.bf16.mxu1 %v2839_v1 }
  0xff   : > { %2510 = vmatpush3.bf16.msra.mxu1 %v2700_v14 }
 0x100   : > { %2521 = vmatprep.subr.bf16.mxu1 %v2839_v1 }
 0x102   : > { %2512 = vmatmul.mubr.msk.bf16.vlgmr.msra.gmra.mxu1 %vm631_vm1, %v3013_v5 }
 0x103   : > { %2523 = vmatprep.mubr.msk.bf16.mxu1 %vm2840_vm0, %v2839_v1 }
 0x1b2   : > { %v847_v28 = vpop.f32.mrf.mxu1 }
 0x1b3   : > { %v848_v29 = vadd.f32 %v847_v28, %v3053_v27 }
 0x1b4   : > { %v2483_v30 = vpop.f32.mrf.mxu1 }
 0x1b5   : > { %v853_v31 = vsel %vm806_vm2, %v848_v29, -inf }
 0x1b6   : > { %854 = vmax.xlane.f32.xlu0 %v853_v31  ;;  %v850_v32 = vpop.f32.mrf.mxu1 }
 0x1b8   : > { %v2484_v33 = vpop.f32.mrf.mxu1 }
 0x1ba   : > { %v977_v55 = vpop.f32.mrf.mxu1 }
 0x1bb   : > { %v978_v10 = vadd.f32 %v2292_v3, %v977_v55 }
 0x1bc   : > { %v2497_v56 = vpop.f32.mrf.mxu1 }
 0x1bd   : > { %v1113_v12 = vpack.c.bf16 %v978_v10, %v978_v10 }
 0x1be   : > { %v980_v57 = vpop.f32.mrf.mxu1 }
 0x1bf   : > { %v2334_v57 = vld [vmem:[%s3388_s7 + $0x2] ss:$0 sm:$0xff] }
 0x1c0   : > { %v2498_v58 = vpop.f32.mrf.mxu1 }
 0x1c2   : > { %v1107_v22 = vpop.f32.mrf.mxu1 }
 0x1c3   : > { %v1108_v23 = vadd.f32 %v2310_v21, %v1107_v22 }
 0x1c4   : > { %v2513_v24 = vpop.f32.mrf.mxu1 }
 0x1c5   : > { %v1176_v25 = vpack.c.bf16 %v1108_v23, %v1108_v23 }
 0x1c6   : > { %v1110_v26 = vpop.f32.mrf.mxu1 }
 0x1c7   : > { %v1181_v28 = vsel %vm872_vm3, %v1176_v25, 0 }
 0x1c8   : > { %2522 = vmatpush3.bf16.msra.mxu1 %v1181_v28 }
 0x1c9   : > { %2533 = vmatprep.subr.bf16.mxu1 %v2839_v1 }
 0x23f   : > { %v855_v34 = vpop.xlane.xlu0 %854 }
 0x240   : > { %v856_v35 = vsub.f32 %v848_v29, %v855_v34  ;;  %v2514_v29 = vpop.f32.mrf.mxu1 }
 0x241   : > { %v2343_v29 = vld [vmem:[%s3390_s9 + $0x2] ss:$0 sm:$0xff] }
 0x242   : > { %v857_v36 = vmul.f32 1.442695, %v856_v35  ;;  %v2317_v35 = vld [vmem:[%s3391_s10 + $0x4] sm:$0xf] }
 0x244   : > { %2713 = vpow2.f32 %v857_v36  ;;  %v1230_v36 = vsel %vm872_vm3, %v2317_v35, 0 }
 0x251   : > { %v2714_v37 = vpop.eup %2713 }
 0x252   : > { %v859_v38 = vsel %vm806_vm2, %v2714_v37, 0.0 }
 0x253   : > { %860 = vadd.xlane.f32.xlu0 %v859_v38 }
 0x2dc   : > { %v861_v49 = vpop.xlane.xlu0 %860 }
 0x2dd   : > { %2715 = vrcp.f32 %v861_v49 }
 0x2ea   : > { %v2716_v50 = vpop.eup %2715 }
 0x2eb   : > { %v864_v51 = vmul.f32 %v2716_v50, %v2714_v37 }
 0x2ed   : > { %v865_v53 = vpack.c.bf16 %v864_v51, %v864_v51  ;;  %v2704_v51 = vld [vmem:[%s3385_s4 + $0x20] sm:$0xff]  }
 0x2ef   : > { %2488 = vmatmul.mubr.msk.bf16.vlgmr.msra.gmra.mxu0 %vm806_vm2, %v865_v53  ;;  %867 = vst.msk [vmem:[%s3083_s27] sm:$0xf] %vm866_vm4, %v865_v53 }
 0x2f0   : > { %2500 = vmatpush3.bf16.msra.mxu0 %v2695_v52  ;;  %2503 = vmatprep.mubr.msk.bf16.mxu0 %vm2840_vm0, %v2839_v1 }
 0x2f1   : > { %2501 = vmatprep.subr.bf16.mxu0 %v2839_v1 }
 0x2f4   : > { %2502 = vmatpush3.bf16.msra.mxu0 %v2697_v54 }
 0x2f5   : > { %2515 = vmatprep.subr.bf16.mxu0 %v2839_v1 }
 0x2f7   : > { %2504 = vmatmul.mubr.msk.bf16.vlgmr.msra.gmra.mxu0 %vm631_vm1, %v3013_v5 }
 0x2f8   : > { %2517 = vmatprep.mubr.msk.bf16.mxu0 %vm2840_vm0, %v2839_v1 }
 0x3af   : > { %v3098_v59 = vpop.f32.mrf.mxu0 }
 0x3b0   : > { %v916_v44 = vpack.c.bf16 %v3098_v59, %v3098_v59 }
 0x3b1   : > { %v2489_v60 = vpop.f32.mrf.mxu0 }
 0x3b3   : > { %v913_v61 = vpop.f32.mrf.mxu0 }
 0x3b5   : > { %v2490_v62 = vpop.f32.mrf.mxu0 }
 0x3b7   : > { %v1042_v0 = vpop.f32.mrf.mxu0 }
 0x3b8   : > { %v1043_v2 = vadd.f32 %v2301_v63, %v1042_v0 }
 0x3b9   : > { %v2505_v4 = vpop.f32.mrf.mxu0 }
 0x3ba   : > { %v1114_v7 = vpack.c.bf16 %v1043_v2, %v1043_v2 }
 0x3bb   : > { %v1045_v8 = vpop.f32.mrf.mxu0 }
 0x3bc   : > { %v1119_v9 = vsel %vm806_vm2, %v1114_v7, 0  ;;  %v2325_v8 = vld [vmem:[%s3386_s5 + $0x2] ss:$0 sm:$0xff] }
 0x3bd   : > { %v2506_v11 = vpop.f32.mrf.mxu0  ;;  %2516 = vmatpush3.bf16.xpose.msra.mxu0 %v1119_v9 }
 0x3be   : > { %2527 = vmatprep.subr.bf16.mxu0 %v2839_v1 }
 0x3c4   : > { %2518 = vmatmul.mubr.msk.bf16.vlgmr.msra.gmra.mxu0 %vm806_vm2, %v1113_v12 }
 0x3c5   : > { %2529 = vmatprep.mubr.msk.bf16.mxu0 %vm2840_vm0, %v2839_v1  ;;  %2528 = vmatpush3.bf16.msra.mxu0 %v1230_v36 }
 0x3c6   : > { %2539 = vmatprep.subr.bf16.mxu0 %v2839_v1 }
 0x484   : > { %v1155_v15 = vpop.f32.mrf.mxu0 }
 0x485   : > { %v1156_v16 = vadd.f32 %v1155_v15, %v3053_v27  ;;  %v2705_v15 = vld [vmem:[%s3389_s8 + $0x28] sm:$0xff]  }
 0x486   : > { %v2519_v17 = vpop.f32.mrf.mxu0 }
 0x487   : > { %v1161_v18 = vsel %vm806_vm2, %v1156_v16, -inf }
 0x488   : > { %1162 = vmax.xlane.f32.xlu1 %v1161_v18  ;;  %v1158_v19 = vpop.f32.mrf.mxu0 }
 0x48a   : > { %v2520_v20 = vpop.f32.mrf.mxu0 }
 0x511   : > { %v1163_v30 = vpop.xlane.xlu1 %1162 }
 0x512   : > { %v1164_v31 = vsub.f32 %v1156_v16, %v1163_v30  ;;  %v2706_v16 = vld [vmem:[%s3389_s8 + $0x20] sm:$0xff]  }
 0x514   : > { %v1165_v32 = vmul.f32 1.442695, %v1164_v31 }
 0x516   : > { %2717 = vpow2.f32 %v1165_v32 }
 0x523   : > { %v2718_v33 = vpop.eup %2717 }
 0x524   : > { %v1167_v34 = vsel %vm806_vm2, %v2718_v33, 0.0 }
 0x525   : > { %1168 = vadd.xlane.f32.xlu1 %v1167_v34 }
 0x5ae   : > { %v1169_v37 = vpop.xlane.xlu1 %1168 }
 0x5af   : > { %2719 = vrcp.f32 %v1169_v37  ;;  %v2350_v37 = vld [vmem:[%s3391_s10 + $0x8] sm:$0xf] }
 0x5bc   : > { %v2720_v38 = vpop.eup %2719 }
 0x5bd   : > { %v1172_v40 = vmul.f32 %v2720_v38, %v2718_v33  ;;  %v1630_v38 = vsel %vm872_vm3, %v2350_v37, 0 }
 0x5bf   : > { %v1173_v41 = vpack.c.bf16 %v1172_v40, %v1172_v40 }
 0x5c1   : > { %2524 = vmatmul.mubr.msk.bf16.vlgmr.msra.gmra.mxu1 %vm806_vm2, %v1173_v41  ;;  %2315 = vst.msk [vmem:[%s3083_s27 + $0x4] sm:$0xf] %vm866_vm4, %v1173_v41 }
 0x5c2   : > { %2534 = vmatpush3.bf16.msra.mxu1 %v1276_v42  ;;  %2535 = vmatprep.mubr.msk.bf16.mxu1 %vm2840_vm0, %v2839_v1 }
 0x5c3   : > { %2547 = vmatprep.subr.bf16.mxu1 %v2839_v1 }
 0x5c9   : > { %2536 = vmatmul.mubr.msk.bf16.vlgmr.msra.gmra.mxu1 %vm806_vm2, %v916_v44  ;;  %v2710_v44 = vld [vmem:[%s3385_s4 + $0x30] sm:$0xff]  }
 0x5ca   : > { %2548 = vmatpush3.bf16.msra.mxu1 %v2701_v43  ;;  %2551 = vmatprep.mubr.msk.bf16.mxu1 %vm2840_vm0, %v2839_v1  ;;  %v2708_v43 = vld [vmem:[%s3385_s4 + $0x38] sm:$0xff]  }
 0x5cb   : > { %2549 = vmatprep.subr.bf16.mxu1 %v2839_v1 }
 0x5ce   : > { %2550 = vmatpush3.bf16.msra.mxu1 %v2702_v45 }
 0x5cf   : > { %2563 = vmatprep.subr.bf16.mxu1 %v2839_v1 }
 0x5d1   : > { %2552 = vmatmul.mubr.msk.bf16.vlgmr.msra.gmra.mxu1 %vm631_vm1, %v3013_v5 }
 0x5d2   : > { %2565 = vmatprep.mubr.msk.bf16.mxu1 %vm2840_vm0, %v2839_v1 }
 0x681   : > { %v1217_v46 = vpop.f32.mrf.mxu1 }
 0x682   : > { %v1223_v48 = vpack.c.bf16 %v1217_v46, %v1217_v46  ;;  %v2707_v46 = vld [vmem:[%s3387_s6 + $0x38] sm:$0xff]  }
 0x683   : > { %v2525_v49 = vpop.f32.mrf.mxu1 }
 0x684   : > { %2530 = vmatmul.mubr.msk.bf16.vlgmr.msra.gmra.mxu0 %vm806_vm2, %v1223_v48 }
 0x685   : > { %v1220_v50 = vpop.f32.mrf.mxu1  ;;  %2540 = vmatpush3.bf16.msra.mxu0 %v2703_v47  ;;  %2543 = vmatprep.mubr.msk.bf16.mxu0 %vm2840_vm0, %v2839_v1 }
 0x686   : > { %2541 = vmatprep.subr.bf16.mxu0 %v2839_v1  ;;  %v2709_v50 = vld [vmem:[%s3387_s6 + $0x30] sm:$0xff]  }
 0x687   : > { %v2526_v52 = vpop.f32.mrf.mxu1 }
 0x689   : > { %v3173_v53 = vpop.f32.mrf.mxu1  ;;  %2542 = vmatpush3.bf16.msra.mxu0 %v2704_v51 }
 0x68a   : > { %2555 = vmatprep.subr.bf16.mxu0 %v2839_v1 }
 0x68b   : > { %v2537_v54 = vpop.f32.mrf.mxu1 }
 0x68c   : > { %2544 = vmatmul.mubr.msk.bf16.vlgmr.msra.gmra.mxu0 %vm631_vm1, %v3015_v6 }
 0x68d   : > { %v1315_v55 = vpop.f32.mrf.mxu1  ;;  %2559 = vmatprep.mubr.msk.bf16.mxu0 %vm2840_vm0, %v2839_v1  ;;  %2556 = vmatpush3.bf16.msra.mxu0 %v2705_v15 }
 0x68e   : > { %2557 = vmatprep.subr.bf16.mxu0 %v2839_v1 }
 0x68f   : > { %v2538_v56 = vpop.f32.mrf.mxu1 }
 0x691   : > { %v1442_v58 = vpop.f32.mrf.mxu1  ;;  %2558 = vmatpush3.bf16.msra.mxu0 %v2706_v16 }
 0x692   : > { %v1443_v59 = vadd.f32 %v2334_v57, %v1442_v58  ;;  %2569 = vmatprep.subr.bf16.mxu0 %v2839_v1 }
 0x693   : > { %v2553_v60 = vpop.f32.mrf.mxu1 }
 0x694   : > { %v1514_v61 = vpack.c.bf16 %v1443_v59, %v1443_v59  ;;  %2560 = vmatmul.mubr.msk.bf16.vlgmr.msra.gmra.mxu0 %vm631_vm1, %v3013_v5 }
 0x695   : > { %v1445_v62 = vpop.f32.mrf.mxu1  ;;  %2571 = vmatprep.mubr.msk.bf16.mxu0 %vm2840_vm0, %v2839_v1 }
 0x696   : > { %v1519_v63 = vsel %vm806_vm2, %v1514_v61, 0 }
 0x697   : > { %v2554_v0 = vpop.f32.mrf.mxu1  ;;  %2564 = vmatpush3.bf16.xpose.msra.mxu1 %v1519_v63  ;;  %v2366_v63 = vld [vmem:[%s3388_s7 + $0x3] ss:$0 sm:$0xff] }
 0x698   : > { %2575 = vmatprep.subr.bf16.mxu1 %v2839_v1 }
 0x744   : > { %v3185_v2 = vpop.f32.mrf.mxu0 }
 0x745   : > { %v1313_v57 = vadd.f32 %v3173_v53, %v3185_v2 }
 0x746   : > { %v2531_v3 = vpop.f32.mrf.mxu0 }
 0x748   : > { %v1269_v4 = vpop.f32.mrf.mxu0 }
 0x74a   : > { %v2532_v7 = vpop.f32.mrf.mxu0 }
 0x74b   : > { %v2357_v7 = vld [vmem:[%s3386_s5 + $0x3] ss:$0 sm:$0xff] }
 0x74c   : > { %v1377_v9 = vpop.f32.mrf.mxu0 }
 0x74d   : > { %v1378_v10 = vadd.f32 %v2325_v8, %v1377_v9 }
 0x74e   : > { %v2545_v11 = vpop.f32.mrf.mxu0 }
 0x74f   : > { %v1513_v12 = vpack.c.bf16 %v1378_v10, %v1378_v10 }
 0x750   : > { %v1380_v13 = vpop.f32.mrf.mxu0 }
 0x751   : > { %2566 = vmatmul.mubr.msk.bf16.vlgmr.msra.gmra.mxu1 %vm806_vm2, %v1513_v12  ;;  %v2711_v12 = vld [vmem:[%s3389_s8 + $0x38] sm:$0xff]   ;;  %v2712_v13 = vld [vmem:[%s3389_s8 + $0x30] sm:$0xff]  }
 0x752   : > { %v2546_v14 = vpop.f32.mrf.mxu0  ;;  %2577 = vmatprep.mubr.msk.bf16.mxu1 %vm2840_vm0, %v2839_v1  ;;  %2576 = vmatpush3.bf16.msra.mxu1 %v1630_v38 }
 0x753   : > { %2589 = vmatprep.subr.bf16.mxu1 %v2839_v1 }
 0x754   : > { %v1507_v30 = vpop.f32.mrf.mxu0 }
 0x755   : > { %v1508_v31 = vadd.f32 %v2343_v29, %v1507_v30 }
 0x756   : > { %v2561_v32 = vpop.f32.mrf.mxu0 }
 0x757   : > { %v1576_v33 = vpack.c.bf16 %v1508_v31, %v1508_v31  ;;  %v2382_v31 = vld [vmem:[%s3391_s10 + $0xc] sm:$0xf] }
 0x758   : > { %v1510_v34 = vpop.f32.mrf.mxu0  ;;  %v1985_v32 = vsel %vm872_vm3, %v2382_v31, 0 }
 0x759   : > { %v1581_v35 = vsel %vm872_vm3, %v1576_v33, 0 }
 0x75a   : > { %v2562_v36 = vpop.f32.mrf.mxu0  ;;  %2570 = vmatpush3.bf16.msra.mxu0 %v1581_v35 }
 0x75b   : > { %2581 = vmatprep.subr.bf16.mxu0 %v2839_v1 }
 0x811   : > { %v1555_v17 = vpop.f32.mrf.mxu1 }
 0x812   : > { %v1556_v18 = vadd.f32 %v1555_v17, %v3053_v27 }
 0x813   : > { %v2567_v19 = vpop.f32.mrf.mxu1 }
 0x814   : > { %v1561_v20 = vsel %vm806_vm2, %v1556_v18, -inf }
 0x815   : > { %1562 = vmax.xlane.f32.xlu0 %v1561_v20  ;;  %v1558_v21 = vpop.f32.mrf.mxu1 }
 0x817   : > { %v2568_v22 = vpop.f32.mrf.mxu1 }
 0x89e   : > { %v1563_v23 = vpop.xlane.xlu0 %1562 }
 0x89f   : > { %v1564_v24 = vsub.f32 %v1556_v18, %v1563_v23 }
 0x8a1   : > { %v1565_v25 = vmul.f32 1.442695, %v1564_v24 }
 0x8a3   : > { %2721 = vpow2.f32 %v1565_v25 }
 0x8b0   : > { %v2722_v26 = vpop.eup %2721 }
 0x8b1   : > { %v1567_v28 = vsel %vm806_vm2, %v2722_v26, 0.0 }
 0x8b2   : > { %1568 = vadd.xlane.f32.xlu1 %v1567_v28 }
 0x93b   : > { %v1569_v39 = vpop.xlane.xlu1 %1568 }
 0x93c   : > { %2723 = vrcp.f32 %v1569_v39 }
 0x949   : > { %v2724_v40 = vpop.eup %2723 }
 0x94a   : > { %v1572_v41 = vmul.f32 %v2724_v40, %v2722_v26 }
 0x94c   : > { %v1573_v42 = vpack.c.bf16 %v1572_v41, %v1572_v41 }
 0x94e   : > { %2572 = vmatmul.mubr.msk.bf16.vlgmr.msra.gmra.mxu0 %vm806_vm2, %v1573_v42  ;;  %2348 = vst.msk [vmem:[%s3083_s27 + $0x8] sm:$0xf] %vm866_vm4, %v1573_v42 }
 0x94f   : > { %2585 = vmatprep.mubr.msk.bf16.mxu0 %vm2840_vm0, %v2839_v1  ;;  %2582 = vmatpush3.bf16.msra.mxu0 %v2708_v43  ;;  %v2384_v43 = vld [vmem:[%s3392_s11] ss:$0 sm:$0xff] }
 0x950   : > { %2583 = vmatprep.subr.bf16.mxu0 %v2839_v1 }
 0x953   : > { %2584 = vmatpush3.bf16.msra.mxu0 %v2710_v44 }
 0x954   : > { %2597 = vmatprep.subr.bf16.mxu0 %v2839_v1 }
 0x956   : > { %2586 = vmatmul.mubr.msk.bf16.vlgmr.msra.gmra.mxu0 %vm631_vm1, %v3015_v6 }
 0x957   : > { %2601 = vmatprep.mubr.msk.bf16.mxu0 %vm2840_vm0, %v2839_v1  ;;  %2598 = vmatpush3.bf16.msra.mxu0 %v2711_v12 }
 0x958   : > { %2599 = vmatprep.subr.bf16.mxu0 %v2839_v1 }
 0x95b   : > { %2600 = vmatpush3.bf16.msra.mxu0 %v2712_v13 }
 0x95c   : > { %2611 = vmatprep.subr.bf16.mxu0 %v2839_v1 }
 0x95e   : > { %2602 = vmatmul.mubr.msk.bf16.vlgmr.msra.gmra.mxu0 %vm631_vm1, %v3013_v5 }
 0x95f   : > { %2613 = vmatprep.mubr.msk.bf16.mxu0 %vm2840_vm0, %v2839_v1 }
 0xa0e   : > { %v1617_v45 = vpop.f32.mrf.mxu0 }
 0xa0f   : > { %v1623_v47 = vpack.c.bf16 %v1617_v45, %v1617_v45  ;;  %v2036_v45 = vunpack.c.l.bf16 %v3015_v6  ;;  %v2068_v6 = vld [vmem:[%s593_s20] sm:$0xff]  ;;  %s2842_s20 = smov [#allocation4]  }
 0xa10   : > { %v2573_v48 = vpop.f32.mrf.mxu0  ;;  %s2735_s1 = sshll.u32 %s2842_s20, 4  ;;  %s2736_s1 = int_to_ptr.vmem [resolvable:$false] %s2735_s1 }
 0xa11   : > { %2578 = vmatmul.mubr.msk.bf16.vlgmr.msra.gmra.mxu1 %vm806_vm2, %v1623_v47  ;;  %p2738_p1 = scmp.lt.s32.totalorder %s3305_s16, %s2736_s1 }
 0xa12   : > { %v1620_v49 = vpop.f32.mrf.mxu0  ;;  %2590 = vmatpush3.bf16.msra.mxu1 %v2707_v46  ;;  %2593 = vmatprep.mubr.msk.bf16.mxu1 %vm2840_vm0, %v2839_v1 }
 0xa13   : > { %2591 = vmatprep.subr.bf16.mxu1 %v2839_v1 }
 0xa14   : > { %v2574_v51 = vpop.f32.mrf.mxu0 }
 0xa16   : > { %2592 = vmatpush3.bf16.msra.mxu1 %v2709_v50  ;;  %v1732_v52 = vpop.f32.mrf.mxu0 }
 0xa17   : > { %2605 = vmatprep.subr.bf16.mxu1 %v2839_v1  ;;  %v1733_v2 = vadd.f32 %v2357_v7, %v1732_v52  ;;  %v2841_v52 = vmov 0  }
 0xa18   : > { %v2587_v54 = vpop.f32.mrf.mxu0  ;;  %2688 = vset.pattern.permute.xlu0 %v2841_v52 }
 0xa19   : > { %2594 = vmatmul.mubr.msk.bf16.vlgmr.msra.gmra.mxu1 %vm631_vm1, %v3013_v5  ;;  %v1868_v11 = vpack.c.bf16 %v1733_v2, %v1733_v2 }
 0xa1a   : > { %2607 = vmatprep.mubr.msk.bf16.mxu1 %vm2840_vm0, %v2839_v1  ;;  %v1735_v55 = vpop.f32.mrf.mxu0 }
 0xa1c   : > { %v2588_v56 = vpop.f32.mrf.mxu0 }
 0xa1e   : > { %v1862_v5 = vpop.f32.mrf.mxu0 }
 0xa20   : > { %v2603_v25 = vpop.f32.mrf.mxu0 }
 0xa22   : > { %v1865_v28 = vpop.f32.mrf.mxu0 }
 0xa24   : > { %v2604_v30 = vpop.f32.mrf.mxu0 }
 0xad1   : > { %v1666_v58 = vpop.f32.mrf.mxu1 }
 0xad2   : > { %v3252_v59 = vadd.f32 %v1666_v58, %v1313_v57 }
 0xad3   : > { %v2579_v60 = vpop.f32.mrf.mxu1 }
 0xad5   : > { %v1669_v61 = vpop.f32.mrf.mxu1 }
 0xad7   : > { %v2580_v62 = vpop.f32.mrf.mxu1 }
 0xad9   : > { %v1797_v0 = vpop.f32.mrf.mxu1 }
 0xada   : > { %v1798_v3 = vadd.f32 %v2366_v63, %v1797_v0 }
 0xadb   : > { %v2595_v4 = vpop.f32.mrf.mxu1 }
 0xadc   : > { %v1869_v8 = vpack.c.bf16 %v1798_v3, %v1798_v3 }
 0xadd   : > { %v1800_v9 = vpop.f32.mrf.mxu1 }
 0xade   : > { %v1874_v53 = vsel %vm806_vm2, %v1869_v8, 0 }
 0xadf   : > { %v2596_v10 = vpop.f32.mrf.mxu1  ;;  %2606 = vmatpush3.bf16.xpose.msra.mxu1 %v1874_v53 }
 0xae0   : > { %2617 = vmatprep.subr.bf16.mxu1 %v2839_v1 }
 0xae6   : > { %2608 = vmatmul.mubr.msk.bf16.vlgmr.msra.gmra.mxu1 %vm806_vm2, %v1868_v11 }
 0xae7   : > { %2619 = vmatprep.mubr.msk.bf16.mxu1 %vm2840_vm0, %v2839_v1  ;;  %v2375_v1 = vld [vmem:[%s3390_s9 + $0x3] ss:$0 sm:$0xff]  ;;  %2618 = vmatpush3.bf16.msra.mxu1 %v1985_v32 }
 0xba6   : > { %v1910_v14 = vpop.f32.mrf.mxu1 }
 0xba7   : > { %v1911_v15 = vadd.f32 %v1910_v14, %v3053_v27  ;;  %v1863_v27 = vadd.f32 %v2375_v1, %v1862_v5 }
 0xba8   : > { %v2609_v16 = vpop.f32.mrf.mxu1 }
 0xba9   : > { %v1916_v17 = vsel %vm806_vm2, %v1911_v15, -inf  ;;  %v1931_v26 = vpack.c.bf16 %v1863_v27, %v1863_v27 }
 0xbaa   : > { %1917 = vmax.xlane.f32.xlu0 %v1916_v17  ;;  %v1913_v18 = vpop.f32.mrf.mxu1 }
 0xbab   : > { %v1936_v29 = vsel %vm872_vm3, %v1931_v26, 0 }
 0xbac   : > { %v2610_v19 = vpop.f32.mrf.mxu1  ;;  %2612 = vmatpush3.bf16.msra.mxu0 %v1936_v29 }
 0xc33   : > { %v1918_v20 = vpop.xlane.xlu0 %1917 }
 0xc34   : > { %v1919_v21 = vsub.f32 %v1911_v15, %v1918_v20 }
 0xc36   : > { %v1920_v22 = vmul.f32 1.442695, %v1919_v21 }
 0xc38   : > { %2725 = vpow2.f32 %v1920_v22 }
 0xc45   : > { %v2726_v23 = vpop.eup %2725 }
 0xc46   : > { %v1922_v24 = vsel %vm806_vm2, %v2726_v23, 0.0 }
 0xc47   : > { %1923 = vadd.xlane.f32.xlu1 %v1922_v24 }
 0xcd0   : > { %v1924_v33 = vpop.xlane.xlu1 %1923 }
 0xcd1   : > { %2727 = vrcp.f32 %v1924_v33 }
 0xcde   : > { %v2728_v34 = vpop.eup %2727 }
 0xcdf   : > { %v1927_v35 = vmul.f32 %v2728_v34, %v2726_v23 }
 0xce1   : > { %v1928_v36 = vpack.c.bf16 %v1927_v35, %v1927_v35 }
 0xce3   : > { %2614 = vmatmul.mubr.msk.bf16.vlgmr.msra.gmra.mxu0 %vm806_vm2, %v1928_v36  ;;  %2380 = vst.msk [vmem:[%s3083_s27 + $0xc] sm:$0xf] %vm866_vm4, %v1928_v36  ;;  %s2737_s27 = scalar_lea.vmem %s2736_s1, 512 }
 0xce4   : > { %p2739_p2 = scmp.lt.s32.totalorder %s2737_s27, %s2731_s17 }
 0xce6   : > { %p2740_p3 = por %p2739_p2, %p2738_p1 }
 0xce8   : > { %p2741_p5 = pnand %p2740_p3, %p2734_p0 }
 0xda3   : > { %v1972_v37 = vpop.f32.mrf.mxu0 }
 0xda4   : > { %v1978_v38 = vpack.c.bf16 %v1972_v37, %v1972_v37 }
 0xda5   : > { %v2615_v39 = vpop.f32.mrf.mxu0 }
 0xda6   : > { %2620 = vmatmul.mubr.msk.bf16.vlgmr.msra.gmra.mxu1 %vm806_vm2, %v1978_v38 }
 0xda7   : > { %v1975_v40 = vpop.f32.mrf.mxu0 }
 0xda9   : > { %v2616_v41 = vpop.f32.mrf.mxu0 }
 0xe66   : > { %v2021_v42 = vpop.f32.mrf.mxu1 }
 0xe67   : > { %v2027_v44 = vadd.f32 %v2021_v42, %v3252_v59 }
 0xe68   : > { %v2621_v46 = vpop.f32.mrf.mxu1 }
 0xe69   : > { %v2035_v47 = vadd.f32 %v2384_v43, %v2027_v44 }
 0xe6a   : > { %v2024_v48 = vpop.f32.mrf.mxu1 }
 0xe6b   : > { %v2037_v49 = vadd.f32 %v2036_v45, %v2035_v47 }
 0xe6c   : > { %v2622_v50 = vpop.f32.mrf.mxu1 }
 0xe6d   : > { %v2038_v51 = vsel %vm631_vm1, %v2037_v49, 0.0 }
 0xe6e   : > { %2039 = vadd.xlane.f32.xlu0 %v2038_v51 }
 0xe84   : > { %2071 = vperm.xlu0 %2688, %v2068_v6  }
 0xef7   : > { %v2040_v54 = vpop.xlane.xlu0 %2039 }
 0xef8   : > { %v2042_v55 = vmul.f32 0.03125, %v2040_v54 }
 0xefa   : > { %v2043_v56 = vsub.f32 %v2037_v49, %v2042_v55 }
 0xefc   : > { %v2044_v57 = vmul.f32 %v2043_v56, %v2043_v56 }
 0xefe   : > { %v2045_v58 = vsel %vm631_vm1, %v2044_v57, 0.0 }
 0xeff   : > { %2046 = vadd.xlane.f32.xlu1 %v2045_v58 }
 0xf00   : > { %2744 = shalt.err (!%p2741_p5)
}
 0xf01   : > { %s2745_s0 = scalar_lea.hbm %s3310_s26, 256  ;;  %s2749_s20 = scalar_lea.hbm %s3396_s15, 512 }
 0xf02   : > { %p2746_p6 = scmp.ne.s32.totalorder %s3310_s26, %s2745_s0  ;;  %p2750_p10 = scmp.lt.s32.totalorder %s3310_s26, %s3396_s15 }
 0xf03   : > { %p2751_p11 = scmp.lt.s32.totalorder %s2749_s20, %s2745_s0 }
 0xf04   : > { %p2747_p7 = pnand %p2746_p6, %p2966_p4 }
 0xf05   : > { %p2752_p12 = por %p2751_p11, %p2750_p10 }
 0xf06   : > { %p2748_p9 = pneg %p2747_p7 }
 0xf08   : > { %p2753_p13 = pnand %p2752_p12, %p2748_p9 }
 0xf0a   : > { %2756 = shalt.err (!%p2753_p13)
}
 0xf0b   : > { %s2843_s1 = smov 64   ;;  %s2844_s17 = smov 4   ;;  %v2385_v63 = vld [vmem:[%s3393_s12] ss:$0 sm:$0xff]  ;;  %v2072_v7 = vpop.permute.xlu0 %2071  ;;  %vm2076_vm5 = vcmask 257024  }
 0xf0c   : > { %s3412_s27 = scalar_lea.sflag [#allocation5], %s3076_s22  ;;  %s2267_s0 = sshll.u32 %s3076_s22, 2  ;;  %v2386_v3 = vld [vmem:[%s3394_s13] ss:$0 sm:$0xff] }
 0xf0d   : > { %2624 = dma.vmem_to_hbm [thread:$0]  (%p2966_p4), %s3305_s16, 256, %s3310_s26, %s3412_s27, %s2843_s1, %s2843_s1, %s2844_s17  }
 0xf0e   : > { %s2389_s16 = sshll.u32 %s2829_s21, 6  ;;  %s568_s26 = scalar_lea.vmem [#allocation2], %s2267_s0 }
 0xf0f   : > { %s2098_s20 = sshll.u32 %s568_s26, 4  ;;  %s2096_s27 = scalar_lea.hbm %s3395_s14, %s2389_s16  ;;  %s2099_s20 = int_to_ptr.vmem [resolvable:$true] %s2098_s20 }
 0xf10   : > { %s2079_s2 = scalar_lea.sflag [#allocation3], %s3076_s22  ;;  %s2757_s29 = scalar_lea.vmem %s2099_s20, 64 }
 0xf11   : > { %p2758_p0 = scmp.ne.s32.totalorder %s2099_s20, %s2757_s29  ;;  %s2845_s24 = smov [#allocation2]  }
 0xf12   : > { %s2761_s25 = sshll.u32 %s2845_s24, 4  ;;  %s2762_s25 = int_to_ptr.vmem [resolvable:$false] %s2761_s25 }
 0xf13   : > { %p2759_p1 = pnand %p2758_p0, %p2966_p4  ;;  %s2763_s21 = scalar_lea.vmem %s2762_s25, 128 }
 0xf14   : > { %p2764_p3 = scmp.lt.s32.totalorder %s2099_s20, %s2762_s25  ;;  %p2765_p5 = scmp.lt.s32.totalorder %s2763_s21, %s2757_s29 }
 0xf15   : > { %p2760_p2 = pneg %p2759_p1 }
 0xf16   : > { %p2766_p6 = por %p2765_p5, %p2764_p3 }
 0xf18   : > { %p2767_p7 = pnand %p2766_p6, %p2760_p2 }
 0xf88   : > { %v2047_v59 = vpop.xlane.xlu1 %2046 }
 0xf89   : > { %v2048_v60 = vmul.f32 0.03125, %v2047_v59 }
 0xf8b   : > { %v2049_v61 = vadd.f32 1e-05, %v2048_v60 }
 0xf8d   : > { %2729 = vrsqrt.f32 %v2049_v61 }
 0xf9a   : > { %v2730_v62 = vpop.eup %2729 }
 0xf9b   : > { %v2051_v0 = vmul.f32 %v2730_v62, %v2043_v56 }
 0xf9d   : > { %v2059_v4 = vmul.f32 %v2385_v63, %v2051_v0 }
 0xf9f   : > { %v2067_v8 = vadd.f32 %v2386_v3, %v2059_v4 }
 0xfa1   : > { %v2074_v9 = vmul.f32 %v2072_v7, %v2067_v8 }
 0xfa3   : > { %v2075_v53 = vpack.c.bf16 %v2074_v9, %v2074_v9 }
 0xfa5   : > { %2077 = vst.msk [vmem:[%s568_s26] sm:$0xf] %vm2076_vm5, %v2075_v53 }
 0xfa6   : > { %2770 = shalt.err (!%p2767_p7)
}
 0xfa7   : > { %s2771_s0 = scalar_lea.hbm %s2096_s27, 64  ;;  %s2775_s26 = scalar_lea.hbm %s3395_s14, 128 }
 0xfa8   : > { %p2772_p9 = scmp.ne.s32.totalorder %s2096_s27, %s2771_s0  ;;  %p2776_p12 = scmp.lt.s32.totalorder %s2096_s27, %s3395_s14 }
 0xfa9   : > { %p2777_p13 = scmp.lt.s32.totalorder %s2775_s26, %s2771_s0 }
 0xfaa   : > { %p2773_p10 = pnand %p2772_p9, %p2966_p4 }
 0xfab   : > { %p2778_p0 = por %p2777_p13, %p2776_p12 }
 0xfac   : > { %p2774_p11 = pneg %p2773_p10 }
 0xfae   : > { %p2779_p1 = pnand %p2778_p0, %p2774_p11 }
 0xfb0   : > { %2782 = shalt.err (!%p2779_p1)
}
 0xfb1   : > { %2623 = dma.vmem_to_hbm [thread:$0]  (%p2966_p4), %s2099_s20, 64, %s2096_s27, %s2079_s2  }
 0xfb2 PF: > { %p2634_p2 = scmp.ge.s32.totalorder %s2837_s23, 2  ;;  %s2127_s29 = sand.u32 1, %s2817_s18  }
 0xfb3   : > { %s2128_s24 = scalar_lea.sflag [#allocation3], %s2127_s29 }
 0xfb4   : > { %p2628_p3 = pnand %p2634_p2, %p2973_p8 }
 0xfb6   : > { %p2629_p5 = pneg %p2628_p3 }
 0xfb8   : > { %2808 = dma.done.wait (%p2629_p5), %s2128_s24, 64  }
 0xfb9   : > { %2810 = vsyncadd (%p2629_p5), %s2128_s24, 4294967232  ;;  %s2137_s25 = scalar_lea.sflag [#allocation5], %s2127_s29 }
 0xfba   : > { %2812 = dma.done.wait (%p2629_p5), %s2137_s25, 256  }
 0xfbb   : > { %2814 = vsyncadd (%p2629_p5), %s2137_s25, 4294967040  ;;  %s32_s23 = sadd.s32 1, %s2837_s23   ;;  %s3413_s28 = sld [smem:[#allocation8_spill]] }
 0xfbc   : > { %p29_p6 = scmp.ge.s32.totalorder %s32_s23, 4   ;;  %s3414_s20 = sld [smem:[#allocation11_spill]] }
 0xfbd   : > { %s3415_s21 = sld [smem:[#allocation9_spill]]  ;;  %s3417_s18 = smov %s2821_s19 }
 0xfbe   : > { %s3416_s22 = sld [smem:[#allocation10_spill]]  ;;  %31 = sbr.rel (!%p29_p6) target bundleno = 10 (0xa), region = 161 }
 0xfc1   : > { %s3418_s19 = smov %s3413_s28 }
 0xfc3   :  { %2142 = vsyncpa [#allocation3], 1 }
 0xfc4   :  { %2144 = vsyncpa [#allocation3 + $0x1], 1 }
 0xfc5   :  { %2145 = vsyncpa [#allocation5], 1 }
 0xfc6   :  { %2147 = vsyncpa [#allocation5 + $0x1], 1 }

</bundles_post_ra>
